<compile_context>
chip_gen: v7x
topology: tpu7x:2x2x1
jax: 0.10.0
libtpu: 0.0.40
codegen_flags: <defaults>
</compile_context>

<pallas_src>
import numpy as np
import jax
import jax.numpy as jnp
from jax import lax
from jax.experimental import pallas as pl
from jax.experimental.pallas import tpu as pltpu

EPS = 1e-5      # nn.InstanceNorm2d default eps
LANE = 128
ROW0 = 8        # sublane-aligned row where data starts inside inter-layer slabs


def _round_up(x, m):
    return (x + m - 1) // m * m


# ---------------------------------------------------------------------------
# Static layer planning (mirrors PoseEncoder.__init__)
# ---------------------------------------------------------------------------
def plan_pose_encoder(n_downsample, input_dim, dim, h, w):
    cfgs = []

    def add(cin, cout, k, s, p, hin, win):
        ho = (hin + 2 * p - k) // s + 1
        wo = (win + 2 * p - k) // s + 1
        cfgs.append(dict(cin=cin, cout=cout, k=k, s=s, p=p,
                         hin=hin, win=win, ho=ho, wo=wo,
                         kin=_round_up(win * cin, LANE),   # lane-padded (unpadded-W) width
                         wc_out=wo * cout))
        return ho, wo

    hin, win = add(input_dim, dim, 7, 1, 3, h, w)
    d = dim
    for _ in range(n_downsample):
        hin, win = add(d, 2 * d, 4, 2, 1, hin, win)
        d *= 2
    for _ in range(n_downsample - 1):
        hin, win = add(d, d, 5, 1, 2, hin, win)
    return cfgs, d


# ---------------------------------------------------------------------------
# Host-side (one-time) weight packing into kernel-friendly matrices
# ---------------------------------------------------------------------------
def pack_layer(cfg, weight, bias):
    """Pack (Cout, Cin, k, k) conv weight + bias; W-padding folded into columns."""
    k, s, p = cfg["k"], cfg["s"], cfg["p"]
    cin, cout = cfg["cin"], cfg["cout"]
    win, wo = cfg["win"], cfg["wo"]
    kin, wc = cfg["kin"], cfg["wc_out"]

    w_np = np.asarray(weight, np.float32)                    # (Cout, Cin, k, k)
    bm = np.zeros((k, kin, wc), np.float32)
    for i in range(k):
        for ow in range(wo):
            for j in range(k):
                col = s * ow + j - p                          # unpadded data column
                if 0 <= col < win:                            # zero-pad columns dropped
                    bm[i, col * cin:(col + 1) * cin,
                       ow * cout:(ow + 1) * cout] = w_np[:, :, i, j].T

    return dict(
        bm=jnp.asarray(bm.reshape(k * kin, wc), jnp.bfloat16),               # bf16 MXU operand
        brow=jnp.asarray(np.tile(np.asarray(bias, np.float32), wo)[None, :]),  # (1, WC) f32
        gsum=jnp.asarray(np.tile(np.eye(cout, dtype=np.float32), (wo, wo))),   # (WC, WC) f32
    )


# ---------------------------------------------------------------------------
# Fused kernel: 4 x (conv -> InstanceNorm -> ReLU), one sample per grid step.
# ---------------------------------------------------------------------------
def _build_kernel(cfgs):
    n_layers = len(cfgs)

    def kernel(*refs):
        it = iter(refs)
        x_ref = next(it)
        layer_refs = [dict(bm=next(it), brow=next(it), gsum=next(it)) for _ in cfgs]
        out_ref = next(it)
        pads = list(it)                      # VMEM scratch slabs for layers 2..L inputs

        for l, (cfg, pr) in enumerate(zip(cfgs, layer_refs)):
            k, s, p = cfg["k"], cfg["s"], cfg["p"]
            ho, wo, wc = cfg["ho"], cfg["wo"], cfg["wc_out"]

            # ---- Convolution: single matmul with K = k * kin (bf16 operands, f32 acc)
            rows = []
            for i in range(k):
                if l == 0:
                    if s == 1:
                        r = x_ref[0, pl.ds(i, ho), :]
                    else:
                        r = x_ref[0, pl.ds(i, ho, stride=s), :]
                else:
                    base = ROW0 - p + i
                    src = pads[l - 1]
                    if s == 1:
                        r = src[pl.ds(base, ho), :]
                    else:
                        r = src[pl.ds(base, ho, stride=s), :]
                rows.append(r.astype(jnp.bfloat16))
            patch = jnp.concatenate(rows, axis=1)                        # (ho, k*kin) bf16
            y = jnp.dot(patch, pr["bm"][...],
                        preferred_element_type=jnp.float32) + pr["brow"][...]

            # ---- InstanceNorm2d (affine=False) + ReLU; stats in f32, one group-sum matmul.
            inv_hw = 1.0 / float(ho * wo)
            s1 = jnp.sum(y, axis=0, keepdims=True)
            s2 = jnp.sum(y * y, axis=0, keepdims=True)
            stats = jnp.dot(jnp.concatenate([s1, s2], axis=0), pr["gsum"][...],
                            preferred_element_type=jnp.float32) * inv_hw  # (2, WC)
            mean = stats[0:1, :]
            var = stats[1:2, :] - mean * mean
            y = jnp.maximum((y - mean) * lax.rsqrt(var + EPS), 0.0)

            if l + 1 < n_layers:
                nxt = cfgs[l + 1]
                dst = pads[l]
                pn, kin_n = nxt["p"], nxt["kin"]
                # Zero only the H-padding border strips (interior fully overwritten
                # below every step; safe regardless of which TensorCore runs which step).
                dst[ROW0 - pn:ROW0, :] = jnp.zeros((pn, kin_n), jnp.float32)
                dst[ROW0 + nxt["hin"]:ROW0 + nxt["hin"] + pn, :] = (
                    jnp.zeros((pn, kin_n), jnp.float32))
                if wc < kin_n:
                    y = jnp.pad(y, ((0, 0), (0, kin_n - wc)))
                # Lane-aligned (col 0), sublane-aligned (row 8), 128-wide store.
                dst[ROW0:ROW0 + ho, :] = y
            else:
                out_ref[0] = y.astype(out_ref.dtype)          # lane-dense (Hout, Wout*Cout)

    return kernel


def build_pose_encoder_forward(cfgs):
    first, last = cfgs[0], cfgs[-1]
    hp1 = first["hin"] + 2 * first["p"]
    slab_rows = [_round_up(ROW0 + c["hin"] + c["p"], 8) for c in cfgs[1:]]
    kernel = _build_kernel(cfgs)

    # Generation-aware VMEM budget (v7x: 64 MiB; v5e/v6e: 128 MiB).
    try:
        vmem_cap = int(pltpu.get_tpu_info().vmem_capacity_bytes)
    except Exception:
        vmem_cap = 64 * 1024 * 1024          # conservative fallback (v7x per-core)

    def _vmem_estimate():
        b = 2 * hp1 * first["kin"] * 4                                  # input (dbl-buffered)
        b += 2 * last["ho"] * last["wc_out"] * 4                        # output
        for c in cfgs:
            b += 2 * c["k"] * c["kin"] * c["wc_out"] * 2                # bm (bf16)
            b += 2 * (c["wc_out"] * c["wc_out"] + c["wc_out"]) * 4      # gsum + brow
        for c, rows in zip(cfgs[1:], slab_rows):
            b += rows * c["kin"] * 4                                    # inter-layer slabs
        return b

    est = _vmem_estimate()
    budget = int(0.7 * vmem_cap)
    assert est < budget, (
        "VMEM budget exceeded for this spatial size; tile the H axis with a "
        "two-pass InstanceNorm (TODO) instead of the whole-image fused path.")
    vmem_limit = int(min(budget, max(32 * 1024 * 1024, 2 * est)))

    def forward(x_nchw, packed):
        batch = x_nchw.shape[0]

        # Module boundary: NCHW -> channels-last, H-padded slab (N, Hp, Kin).
        p = first["p"]
        x = jnp.transpose(x_nchw, (0, 2, 3, 1))                          # NHWC
        x = jnp.pad(x, ((0, 0), (p, p), (0, 0), (0, 0)))                 # zero-pad H only
        x = x.reshape(batch, hp1, first["win"] * first["cin"])
        lane_pad = first["kin"] - first["win"] * first["cin"]
        if lane_pad:
            x = jnp.pad(x, ((0, 0), (0, 0), (0, lane_pad)))

        inputs = [x]
        in_specs = [pl.BlockSpec((1, hp1, first["kin"]), lambda i: (i, 0, 0))]

        def const_map(nd):
            return lambda i, _nd=nd: (0,) * _nd

        # TODO(synk): mark these constant-weight specs single-buffered once
        # pipeline_mode=pl.Buffered(1) is supported end-to-end; they are only
        # fetched once (constant index_map) but still reserve 2x VMEM.
        for pk in packed:
            for name in ("bm", "brow", "gsum"):
                arr = pk[name]
                inputs.append(arr)
                in_specs.append(pl.BlockSpec(arr.shape, const_map(arr.ndim)))

        scratch = [pltpu.VMEM((rows, c["kin"]), jnp.float32)
                   for c, rows in zip(cfgs[1:], slab_rows)]

        out = pl.pallas_call(
            kernel,
            out_shape=jax.ShapeDtypeStruct((batch, last["ho"], last["wc_out"]), jnp.float32),
            grid_spec=pltpu.PrefetchScalarGridSpec(
                num_scalar_prefetch=0,
                grid=(batch,),
                in_specs=in_specs,
                out_specs=pl.BlockSpec((1, last["ho"], last["wc_out"]), lambda i: (i, 0, 0)),
                scratch_shapes=scratch,
            ),
            compiler_params=pltpu.CompilerParams(
                dimension_semantics=("parallel",),    # v7x: samples split across TCs
                vmem_limit_bytes=vmem_limit,
            ),
        )(*inputs)

        # Boundary: (N, Ho, Wo*Cout) -> NCHW.
        out = out.reshape(batch, last["ho"], last["wo"], last["cout"])
        return jnp.transpose(out, (0, 3, 1, 2))

    return forward


# ---------------------------------------------------------------------------
# Synthetic parameters (same shapes as PoseEncoder.__init__ would create)
# ---------------------------------------------------------------------------
def make_pose_encoder_params(key, n_downsample, input_dim, dim):
    layers = [dict(cin=input_dim, cout=dim, k=7, stride=1, pad=3)]
    d = dim
    for _ in range(n_downsample):
        layers.append(dict(cin=d, cout=2 * d, k=4, stride=2, pad=1))
        d *= 2
    for _ in range(n_downsample - 1):
        layers.append(dict(cin=d, cout=d, k=5, stride=1, pad=2))

    params = []
    for cfg in layers:
        key, kw_, kb_ = jax.random.split(key, 3)
        fan_in = cfg["cin"] * cfg["k"] * cfg["k"]
        w = jax.random.normal(kw_, (cfg["cout"], cfg["cin"], cfg["k"], cfg["k"]),
                              jnp.float32) * (1.0 / jnp.sqrt(fan_in))
        b = jax.random.normal(kb_, (cfg["cout"],), jnp.float32) * 0.01
        params.append(dict(weight=w, bias=b, stride=cfg["stride"], pad=cfg["pad"]))
    return params, d


# ---------------------------------------------------------------------------
# Pure-JAX reference (correctness check only)
# ---------------------------------------------------------------------------
def _ref_forward(x, params):
    y = x
    for p in params:
        s, pd = p["stride"], p["pad"]
        y = lax.conv_general_dilated(
            y, p["weight"], (s, s), [(pd, pd), (pd, pd)],
            dimension_numbers=("NCHW", "OIHW", "NCHW"),
            precision=lax.Precision.HIGHEST,
        ) + p["bias"][None, :, None, None]
        mean = y.mean(axis=(2, 3), keepdims=True)
        var = ((y - mean) ** 2).mean(axis=(2, 3), keepdims=True)
        y = jnp.maximum((y - mean) / jnp.sqrt(var + EPS), 0.0)
    return y


if __name__ == "__main__":
    N, C_IN, H, W = 2, 4, 16, 16
    N_DOWNSAMPLE, DIM = 2, 8

    key = jax.random.PRNGKey(0)
    kx, kp = jax.random.split(key)
    x = jax.random.normal(kx, (N, C_IN, H, W), jnp.float32)

    raw_params, output_dim = make_pose_encoder_params(kp, N_DOWNSAMPLE, C_IN, DIM)
    cfgs, planned_dim = plan_pose_encoder(N_DOWNSAMPLE, C_IN, DIM, H, W)
    assert planned_dim == output_dim

    packed = [pack_layer(cfg, p["weight"], p["bias"]) for cfg, p in zip(cfgs, raw_params)]

    forward = jax.jit(build_pose_encoder_forward(cfgs))
    out = jax.block_until_ready(forward(x, packed))
    assert out.shape == (N, output_dim, H // (2 ** N_DOWNSAMPLE), W // (2 ** N_DOWNSAMPLE)), out.shape

    ref = jax.block_until_ready(_ref_forward(x, raw_params))
    max_err = float(jnp.max(jnp.abs(out - ref)))
    # bf16 MXU operands with f32 accumulation/statistics: tolerance relaxed vs f32.
    assert jnp.allclose(out, ref, atol=2e-2, rtol=2e-2), max_err

    print("KERNEL_OK")
</pallas_src>

<mosaic_0001>
module attributes {stable_mosaic.version = 11 : i64} {
  func.func @kernel(%arg0: i32, %arg1: memref<1x22x128xf32, #tpu.memory_space<vmem>>, %arg2: memref<896x128xbf16, #tpu.memory_space<vmem>>, %arg3: memref<1x128xf32, #tpu.memory_space<vmem>>, %arg4: memref<128x128xf32, #tpu.memory_space<vmem>>, %arg5: memref<512x128xbf16, #tpu.memory_space<vmem>>, %arg6: memref<1x128xf32, #tpu.memory_space<vmem>>, %arg7: memref<128x128xf32, #tpu.memory_space<vmem>>, %arg8: memref<512x128xbf16, #tpu.memory_space<vmem>>, %arg9: memref<1x128xf32, #tpu.memory_space<vmem>>, %arg10: memref<128x128xf32, #tpu.memory_space<vmem>>, %arg11: memref<640x128xbf16, #tpu.memory_space<vmem>>, %arg12: memref<1x128xf32, #tpu.memory_space<vmem>>, %arg13: memref<128x128xf32, #tpu.memory_space<vmem>>, %arg14: memref<1x4x128xf32, #tpu.memory_space<vmem>>, %arg15: memref<32x128xf32, #tpu.memory_space<vmem>>, %arg16: memref<24x128xf32, #tpu.memory_space<vmem>>, %arg17: memref<16x128xf32, #tpu.memory_space<vmem>>) attributes {dimension_semantics = [#tpu.dimension_semantics<parallel>], iteration_bounds = array<i64: 2>, scalar_prefetch = 0 : i64, scratch_operands = 3 : i64, tpu.core_type = #tpu.core_type<tc>, window_params = [{transform_indices = @transform_0, window_bounds = array<i64: 1, 22, 128>}, {pipeline_mode = #tpu.pipeline_mode<synchronous>, transform_indices = @transform_1, window_bounds = array<i64: 896, 128>}, {pipeline_mode = #tpu.pipeline_mode<synchronous>, transform_indices = @transform_2, window_bounds = array<i64: 1, 128>}, {pipeline_mode = #tpu.pipeline_mode<synchronous>, transform_indices = @transform_3, window_bounds = array<i64: 128, 128>}, {pipeline_mode = #tpu.pipeline_mode<synchronous>, transform_indices = @transform_4, window_bounds = array<i64: 512, 128>}, {pipeline_mode = #tpu.pipeline_mode<synchronous>, transform_indices = @transform_5, window_bounds = array<i64: 1, 128>}, {pipeline_mode = #tpu.pipeline_mode<synchronous>, transform_indices = @transform_6, window_bounds = array<i64: 128, 128>}, {pipeline_mode = #tpu.pipeline_mode<synchronous>, transform_indices = @transform_7, window_bounds = array<i64: 512, 128>}, {pipeline_mode = #tpu.pipeline_mode<synchronous>, transform_indices = @transform_8, window_bounds = array<i64: 1, 128>}, {pipeline_mode = #tpu.pipeline_mode<synchronous>, transform_indices = @transform_9, window_bounds = array<i64: 128, 128>}, {pipeline_mode = #tpu.pipeline_mode<synchronous>, transform_indices = @transform_10, window_bounds = array<i64: 640, 128>}, {pipeline_mode = #tpu.pipeline_mode<synchronous>, transform_indices = @transform_11, window_bounds = array<i64: 1, 128>}, {pipeline_mode = #tpu.pipeline_mode<synchronous>, transform_indices = @transform_12, window_bounds = array<i64: 128, 128>}, {transform_indices = @transform_13, window_bounds = array<i64: 1, 4, 128>}]} {
    %c0 = arith.constant 0 : index
    %c0_0 = arith.constant 0 : index
    %c0_1 = arith.constant 0 : index
    %0 = vector.load %arg1[%c0, %c0_0, %c0_1] : memref<1x22x128xf32, #tpu.memory_space<vmem>>, vector<1x16x128xf32>
    %1 = vector.shape_cast %0 : vector<1x16x128xf32> to vector<16x128xf32>
    %2 = arith.truncf %1 : vector<16x128xf32> to vector<16x128xbf16>
    %c0_2 = arith.constant 0 : index
    %c1 = arith.constant 1 : index
    %c0_3 = arith.constant 0 : index
    %3 = vector.load %arg1[%c0_2, %c1, %c0_3] : memref<1x22x128xf32, #tpu.memory_space<vmem>>, vector<1x16x128xf32>
    %4 = vector.shape_cast %3 : vector<1x16x128xf32> to vector<16x128xf32>
    %5 = arith.truncf %4 : vector<16x128xf32> to vector<16x128xbf16>
    %c0_4 = arith.constant 0 : index
    %c2 = arith.constant 2 : index
    %c0_5 = arith.constant 0 : index
    %6 = vector.load %arg1[%c0_4, %c2, %c0_5] : memref<1x22x128xf32, #tpu.memory_space<vmem>>, vector<1x16x128xf32>
    %7 = vector.shape_cast %6 : vector<1x16x128xf32> to vector<16x128xf32>
    %8 = arith.truncf %7 : vector<16x128xf32> to vector<16x128xbf16>
    %c0_6 = arith.constant 0 : index
    %c3 = arith.constant 3 : index
    %c0_7 = arith.constant 0 : index
    %9 = vector.load %arg1[%c0_6, %c3, %c0_7] : memref<1x22x128xf32, #tpu.memory_space<vmem>>, vector<1x16x128xf32>
    %10 = vector.shape_cast %9 : vector<1x16x128xf32> to vector<16x128xf32>
    %11 = arith.truncf %10 : vector<16x128xf32> to vector<16x128xbf16>
    %c0_8 = arith.constant 0 : index
    %c4 = arith.constant 4 : index
    %c0_9 = arith.constant 0 : index
    %12 = vector.load %arg1[%c0_8, %c4, %c0_9] : memref<1x22x128xf32, #tpu.memory_space<vmem>>, vector<1x16x128xf32>
    %13 = vector.shape_cast %12 : vector<1x16x128xf32> to vector<16x128xf32>
    %14 = arith.truncf %13 : vector<16x128xf32> to vector<16x128xbf16>
    %c0_10 = arith.constant 0 : index
    %c5 = arith.constant 5 : index
    %c0_11 = arith.constant 0 : index
    %15 = vector.load %arg1[%c0_10, %c5, %c0_11] : memref<1x22x128xf32, #tpu.memory_space<vmem>>, vector<1x16x128xf32>
    %16 = vector.shape_cast %15 : vector<1x16x128xf32> to vector<16x128xf32>
    %17 = arith.truncf %16 : vector<16x128xf32> to vector<16x128xbf16>
    %c0_12 = arith.constant 0 : index
    %c6 = arith.constant 6 : index
    %c0_13 = arith.constant 0 : index
    %18 = vector.load %arg1[%c0_12, %c6, %c0_13] : memref<1x22x128xf32, #tpu.memory_space<vmem>>, vector<1x16x128xf32>
    %19 = vector.shape_cast %18 : vector<1x16x128xf32> to vector<16x128xf32>
    %20 = arith.truncf %19 : vector<16x128xf32> to vector<16x128xbf16>
    %21 = tpu.concatenate %2, %5, %8, %11, %14, %17, %20 in 1 : vector<16x128xbf16>, vector<16x128xbf16>, vector<16x128xbf16>, vector<16x128xbf16>, vector<16x128xbf16>, vector<16x128xbf16>, vector<16x128xbf16> -> vector<16x896xbf16>
    %c0_14 = arith.constant 0 : index
    %c0_15 = arith.constant 0 : index
    %22 = vector.load %arg2[%c0_14, %c0_15] : memref<896x128xbf16, #tpu.memory_space<vmem>>, vector<896x128xbf16>
    %cst = arith.constant dense<0.000000e+00> : vector<16x128xf32>
    %23 = tpu.matmul %21, %22, %cst {dimension_numbers = #tpu.dot_dimension_numbers<[1], [0], [0], [1], [0, 0, 1, 1], [], []>} : vector<16x896xbf16>, vector<896x128xbf16>, vector<16x128xf32> -> vector<16x128xf32>
    %c0_16 = arith.constant 0 : index
    %c0_17 = arith.constant 0 : index
    %24 = vector.load %arg3[%c0_16, %c0_17] : memref<1x128xf32, #tpu.memory_space<vmem>>, vector<1x128xf32>
    %25 = vector.broadcast %24 : vector<1x128xf32> to vector<16x128xf32>
    %26 = arith.addf %23, %25 : vector<16x128xf32>
    %cst_18 = arith.constant dense<0.000000e+00> : vector<128xf32>
    %27 = vector.multi_reduction <add>, %26, %cst_18 [0] : vector<16x128xf32> to vector<128xf32>
    %28 = vector.shape_cast %27 : vector<128xf32> to vector<1x128xf32>
    %29 = arith.mulf %26, %26 : vector<16x128xf32>
    %cst_19 = arith.constant dense<0.000000e+00> : vector<128xf32>
    %30 = vector.multi_reduction <add>, %29, %cst_19 [0] : vector<16x128xf32> to vector<128xf32>
    %31 = vector.shape_cast %30 : vector<128xf32> to vector<1x128xf32>
    %32 = tpu.concatenate %28, %31 in 0 : vector<1x128xf32>, vector<1x128xf32> -> vector<2x128xf32>
    %c0_20 = arith.constant 0 : index
    %c0_21 = arith.constant 0 : index
    %33 = vector.load %arg4[%c0_20, %c0_21] : memref<128x128xf32, #tpu.memory_space<vmem>>, vector<128x128xf32>
    %cst_22 = arith.constant dense<0.000000e+00> : vector<2x128xf32>
    %34 = tpu.matmul %32, %33, %cst_22 {dimension_numbers = #tpu.dot_dimension_numbers<[1], [0], [0], [1], [0, 0, 1, 1], [], []>} : vector<2x128xf32>, vector<128x128xf32>, vector<2x128xf32> -> vector<2x128xf32>
    %cst_23 = arith.constant 3.906250e-03 : f32
    %35 = vector.broadcast %cst_23 : f32 to vector<2x128xf32>
    %36 = arith.mulf %34, %35 : vector<2x128xf32>
    %37 = vector.extract_strided_slice %36 {offsets = [0, 0], sizes = [1, 128], strides = [1, 1]} : vector<2x128xf32> to vector<1x128xf32>
    %38 = vector.extract_strided_slice %36 {offsets = [1, 0], sizes = [1, 128], strides = [1, 1]} : vector<2x128xf32> to vector<1x128xf32>
    %39 = arith.mulf %37, %37 : vector<1x128xf32>
    %40 = arith.subf %38, %39 : vector<1x128xf32>
    %41 = vector.broadcast %37 : vector<1x128xf32> to vector<16x128xf32>
    %42 = arith.subf %26, %41 : vector<16x128xf32>
    %cst_24 = arith.constant 9.99999974E-6 : f32
    %43 = vector.broadcast %cst_24 : f32 to vector<1x128xf32>
    %44 = arith.addf %40, %43 : vector<1x128xf32>
    %45 = math.rsqrt %44 : vector<1x128xf32>
    %46 = vector.broadcast %45 : vector<1x128xf32> to vector<16x128xf32>
    %47 = arith.mulf %42, %46 : vector<16x128xf32>
    %cst_25 = arith.constant 0.000000e+00 : f32
    %48 = vector.broadcast %cst_25 : f32 to vector<16x128xf32>
    %49 = arith.maximumf %47, %48 : vector<16x128xf32>
    %cst_26 = arith.constant 0.000000e+00 : f32
    %50 = vector.broadcast %cst_26 : f32 to vector<1x128xf32>
    %c7 = arith.constant 7 : index
    %c0_27 = arith.constant 0 : index
    %51 = vector.load %arg15[%c7, %c0_27] : memref<32x128xf32, #tpu.memory_space<vmem>>, vector<1x128xf32>
    tpu.vector_store %arg15[%c7, %c0_27], %50 {strides = array<i32>} : memref<32x128xf32, #tpu.memory_space<vmem>>, vector<1x128xf32>,
    %cst_28 = arith.constant 0.000000e+00 : f32
    %52 = vector.broadcast %cst_28 : f32 to vector<1x128xf32>
    %c24 = arith.constant 24 : index
    %c0_29 = arith.constant 0 : index
    %53 = vector.load %arg15[%c24, %c0_29] : memref<32x128xf32, #tpu.memory_space<vmem>>, vector<1x128xf32>
    tpu.vector_store %arg15[%c24, %c0_29], %52 {strides = array<i32>} : memref<32x128xf32, #tpu.memory_space<vmem>>, vector<1x128xf32>,
    %c8 = arith.constant 8 : index
    %c0_30 = arith.constant 0 : index
    %54 = vector.load %arg15[%c8, %c0_30] : memref<32x128xf32, #tpu.memory_space<vmem>>, vector<16x128xf32>
    tpu.vector_store %arg15[%c8, %c0_30], %49 {strides = array<i32>} : memref<32x128xf32, #tpu.memory_space<vmem>>, vector<16x128xf32>,
    %c7_31 = arith.constant 7 : index
    %c0_32 = arith.constant 0 : index
    %55 = tpu.strided_load %arg15[%c7_31, %c0_32] {strides = array<i32: 2, 1>} : memref<32x128xf32, #tpu.memory_space<vmem>>, vector<8x128xf32>
    %56 = arith.truncf %55 : vector<8x128xf32> to vector<8x128xbf16>
    %c8_33 = arith.constant 8 : index
    %c0_34 = arith.constant 0 : index
    %57 = tpu.strided_load %arg15[%c8_33, %c0_34] {strides = array<i32: 2, 1>} : memref<32x128xf32, #tpu.memory_space<vmem>>, vector<8x128xf32>
    %58 = arith.truncf %57 : vector<8x128xf32> to vector<8x128xbf16>
    %c9 = arith.constant 9 : index
    %c0_35 = arith.constant 0 : index
    %59 = tpu.strided_load %arg15[%c9, %c0_35] {strides = array<i32: 2, 1>} : memref<32x128xf32, #tpu.memory_space<vmem>>, vector<8x128xf32>
    %60 = arith.truncf %59 : vector<8x128xf32> to vector<8x128xbf16>
    %c10 = arith.constant 10 : index
    %c0_36 = arith.constant 0 : index
    %61 = tpu.strided_load %arg15[%c10, %c0_36] {strides = array<i32: 2, 1>} : memref<32x128xf32, #tpu.memory_space<vmem>>, vector<8x128xf32>
    %62 = arith.truncf %61 : vector<8x128xf32> to vector<8x128xbf16>
    %63 = tpu.concatenate %56, %58, %60, %62 in 1 : vector<8x128xbf16>, vector<8x128xbf16>, vector<8x128xbf16>, vector<8x128xbf16> -> vector<8x512xbf16>
    %c0_37 = arith.constant 0 : index
    %c0_38 = arith.constant 0 : index
    %64 = vector.load %arg5[%c0_37, %c0_38] : memref<512x128xbf16, #tpu.memory_space<vmem>>, vector<512x128xbf16>
    %cst_39 = arith.constant dense<0.000000e+00> : vector<8x128xf32>
    %65 = tpu.matmul %63, %64, %cst_39 {dimension_numbers = #tpu.dot_dimension_numbers<[1], [0], [0], [1], [0, 0, 1, 1], [], []>} : vector<8x512xbf16>, vector<512x128xbf16>, vector<8x128xf32> -> vector<8x128xf32>
    %c0_40 = arith.constant 0 : index
    %c0_41 = arith.constant 0 : index
    %66 = vector.load %arg6[%c0_40, %c0_41] : memref<1x128xf32, #tpu.memory_space<vmem>>, vector<1x128xf32>
    %67 = vector.broadcast %66 : vector<1x128xf32> to vector<8x128xf32>
    %68 = arith.addf %65, %67 : vector<8x128xf32>
    %cst_42 = arith.constant dense<0.000000e+00> : vector<128xf32>
    %69 = vector.multi_reduction <add>, %68, %cst_42 [0] : vector<8x128xf32> to vector<128xf32>
    %70 = vector.shape_cast %69 : vector<128xf32> to vector<1x128xf32>
    %71 = arith.mulf %68, %68 : vector<8x128xf32>
    %cst_43 = arith.constant dense<0.000000e+00> : vector<128xf32>
    %72 = vector.multi_reduction <add>, %71, %cst_43 [0] : vector<8x128xf32> to vector<128xf32>
    %73 = vector.shape_cast %72 : vector<128xf32> to vector<1x128xf32>
    %74 = tpu.concatenate %70, %73 in 0 : vector<1x128xf32>, vector<1x128xf32> -> vector<2x128xf32>
    %c0_44 = arith.constant 0 : index
    %c0_45 = arith.constant 0 : index
    %75 = vector.load %arg7[%c0_44, %c0_45] : memref<128x128xf32, #tpu.memory_space<vmem>>, vector<128x128xf32>
    %cst_46 = arith.constant dense<0.000000e+00> : vector<2x128xf32>
    %76 = tpu.matmul %74, %75, %cst_46 {dimension_numbers = #tpu.dot_dimension_numbers<[1], [0], [0], [1], [0, 0, 1, 1], [], []>} : vector<2x128xf32>, vector<128x128xf32>, vector<2x128xf32> -> vector<2x128xf32>
    %cst_47 = arith.constant 1.562500e-02 : f32
    %77 = vector.broadcast %cst_47 : f32 to vector<2x128xf32>
    %78 = arith.mulf %76, %77 : vector<2x128xf32>
    %79 = vector.extract_strided_slice %78 {offsets = [0, 0], sizes = [1, 128], strides = [1, 1]} : vector<2x128xf32> to vector<1x128xf32>
    %80 = vector.extract_strided_slice %78 {offsets = [1, 0], sizes = [1, 128], strides = [1, 1]} : vector<2x128xf32> to vector<1x128xf32>
    %81 = arith.mulf %79, %79 : vector<1x128xf32>
    %82 = arith.subf %80, %81 : vector<1x128xf32>
    %83 = vector.broadcast %79 : vector<1x128xf32> to vector<8x128xf32>
    %84 = arith.subf %68, %83 : vector<8x128xf32>
    %cst_48 = arith.constant 9.99999974E-6 : f32
    %85 = vector.broadcast %cst_48 : f32 to vector<1x128xf32>
    %86 = arith.addf %82, %85 : vector<1x128xf32>
    %87 = math.rsqrt %86 : vector<1x128xf32>
    %88 = vector.broadcast %87 : vector<1x128xf32> to vector<8x128xf32>
    %89 = arith.mulf %84, %88 : vector<8x128xf32>
    %cst_49 = arith.constant 0.000000e+00 : f32
    %90 = vector.broadcast %cst_49 : f32 to vector<8x128xf32>
    %91 = arith.maximumf %89, %90 : vector<8x128xf32>
    %cst_50 = arith.constant 0.000000e+00 : f32
    %92 = vector.broadcast %cst_50 : f32 to vector<1x128xf32>
    %c7_51 = arith.constant 7 : index
    %c0_52 = arith.constant 0 : index
    %93 = vector.load %arg16[%c7_51, %c0_52] : memref<24x128xf32, #tpu.memory_space<vmem>>, vector<1x128xf32>
    tpu.vector_store %arg16[%c7_51, %c0_52], %92 {strides = array<i32>} : memref<24x128xf32, #tpu.memory_space<vmem>>, vector<1x128xf32>,
    %cst_53 = arith.constant 0.000000e+00 : f32
    %94 = vector.broadcast %cst_53 : f32 to vector<1x128xf32>
    %c16 = arith.constant 16 : index
    %c0_54 = arith.constant 0 : index
    %95 = vector.load %arg16[%c16, %c0_54] : memref<24x128xf32, #tpu.memory_space<vmem>>, vector<1x128xf32>
    tpu.vector_store %arg16[%c16, %c0_54], %94 {strides = array<i32>} : memref<24x128xf32, #tpu.memory_space<vmem>>, vector<1x128xf32>,
    %c8_55 = arith.constant 8 : index
    %c0_56 = arith.constant 0 : index
    %96 = vector.load %arg16[%c8_55, %c0_56] : memref<24x128xf32, #tpu.memory_space<vmem>>, vector<8x128xf32>
    tpu.vector_store %arg16[%c8_55, %c0_56], %91 {strides = array<i32>} : memref<24x128xf32, #tpu.memory_space<vmem>>, vector<8x128xf32>,
    %c7_57 = arith.constant 7 : index
    %c0_58 = arith.constant 0 : index
    %97 = tpu.strided_load %arg16[%c7_57, %c0_58] {strides = array<i32: 2, 1>} : memref<24x128xf32, #tpu.memory_space<vmem>>, vector<4x128xf32>
    %98 = arith.truncf %97 : vector<4x128xf32> to vector<4x128xbf16>
    %c8_59 = arith.constant 8 : index
    %c0_60 = arith.constant 0 : index
    %99 = tpu.strided_load %arg16[%c8_59, %c0_60] {strides = array<i32: 2, 1>} : memref<24x128xf32, #tpu.memory_space<vmem>>, vector<4x128xf32>
    %100 = arith.truncf %99 : vector<4x128xf32> to vector<4x128xbf16>
    %c9_61 = arith.constant 9 : index
    %c0_62 = arith.constant 0 : index
    %101 = tpu.strided_load %arg16[%c9_61, %c0_62] {strides = array<i32: 2, 1>} : memref<24x128xf32, #tpu.memory_space<vmem>>, vector<4x128xf32>
    %102 = arith.truncf %101 : vector<4x128xf32> to vector<4x128xbf16>
    %c10_63 = arith.constant 10 : index
    %c0_64 = arith.constant 0 : index
    %103 = tpu.strided_load %arg16[%c10_63, %c0_64] {strides = array<i32: 2, 1>} : memref<24x128xf32, #tpu.memory_space<vmem>>, vector<4x128xf32>
    %104 = arith.truncf %103 : vector<4x128xf32> to vector<4x128xbf16>
    %105 = tpu.concatenate %98, %100, %102, %104 in 1 : vector<4x128xbf16>, vector<4x128xbf16>, vector<4x128xbf16>, vector<4x128xbf16> -> vector<4x512xbf16>
    %c0_65 = arith.constant 0 : index
    %c0_66 = arith.constant 0 : index
    %106 = vector.load %arg8[%c0_65, %c0_66] : memref<512x128xbf16, #tpu.memory_space<vmem>>, vector<512x128xbf16>
    %cst_67 = arith.constant dense<0.000000e+00> : vector<4x128xf32>
    %107 = tpu.matmul %105, %106, %cst_67 {dimension_numbers = #tpu.dot_dimension_numbers<[1], [0], [0], [1], [0, 0, 1, 1], [], []>} : vector<4x512xbf16>, vector<512x128xbf16>, vector<4x128xf32> -> vector<4x128xf32>
    %c0_68 = arith.constant 0 : index
    %c0_69 = arith.constant 0 : index
    %108 = vector.load %arg9[%c0_68, %c0_69] : memref<1x128xf32, #tpu.memory_space<vmem>>, vector<1x128xf32>
    %109 = vector.broadcast %108 : vector<1x128xf32> to vector<4x128xf32>
    %110 = arith.addf %107, %109 : vector<4x128xf32>
    %cst_70 = arith.constant dense<0.000000e+00> : vector<128xf32>
    %111 = vector.multi_reduction <add>, %110, %cst_70 [0] : vector<4x128xf32> to vector<128xf32>
    %112 = vector.shape_cast %111 : vector<128xf32> to vector<1x128xf32>
    %113 = arith.mulf %110, %110 : vector<4x128xf32>
    %cst_71 = arith.constant dense<0.000000e+00> : vector<128xf32>
    %114 = vector.multi_reduction <add>, %113, %cst_71 [0] : vector<4x128xf32> to vector<128xf32>
    %115 = vector.shape_cast %114 : vector<128xf32> to vector<1x128xf32>
    %116 = tpu.concatenate %112, %115 in 0 : vector<1x128xf32>, vector<1x128xf32> -> vector<2x128xf32>
    %c0_72 = arith.constant 0 : index
    %c0_73 = arith.constant 0 : index
    %117 = vector.load %arg10[%c0_72, %c0_73] : memref<128x128xf32, #tpu.memory_space<vmem>>, vector<128x128xf32>
    %cst_74 = arith.constant dense<0.000000e+00> : vector<2x128xf32>
    %118 = tpu.matmul %116, %117, %cst_74 {dimension_numbers = #tpu.dot_dimension_numbers<[1], [0], [0], [1], [0, 0, 1, 1], [], []>} : vector<2x128xf32>, vector<128x128xf32>, vector<2x128xf32> -> vector<2x128xf32>
    %cst_75 = arith.constant 6.250000e-02 : f32
    %119 = vector.broadcast %cst_75 : f32 to vector<2x128xf32>
    %120 = arith.mulf %118, %119 : vector<2x128xf32>
    %121 = vector.extract_strided_slice %120 {offsets = [0, 0], sizes = [1, 128], strides = [1, 1]} : vector<2x128xf32> to vector<1x128xf32>
    %122 = vector.extract_strided_slice %120 {offsets = [1, 0], sizes = [1, 128], strides = [1, 1]} : vector<2x128xf32> to vector<1x128xf32>
    %123 = arith.mulf %121, %121 : vector<1x128xf32>
    %124 = arith.subf %122, %123 : vector<1x128xf32>
    %125 = vector.broadcast %121 : vector<1x128xf32> to vector<4x128xf32>
    %126 = arith.subf %110, %125 : vector<4x128xf32>
    %cst_76 = arith.constant 9.99999974E-6 : f32
    %127 = vector.broadcast %cst_76 : f32 to vector<1x128xf32>
    %128 = arith.addf %124, %127 : vector<1x128xf32>
    %129 = math.rsqrt %128 : vector<1x128xf32>
    %130 = vector.broadcast %129 : vector<1x128xf32> to vector<4x128xf32>
    %131 = arith.mulf %126, %130 : vector<4x128xf32>
    %cst_77 = arith.constant 0.000000e+00 : f32
    %132 = vector.broadcast %cst_77 : f32 to vector<4x128xf32>
    %133 = arith.maximumf %131, %132 : vector<4x128xf32>
    %cst_78 = arith.constant 0.000000e+00 : f32
    %134 = vector.broadcast %cst_78 : f32 to vector<2x128xf32>
    %c6_79 = arith.constant 6 : index
    %c0_80 = arith.constant 0 : index
    %135 = vector.load %arg17[%c6_79, %c0_80] : memref<16x128xf32, #tpu.memory_space<vmem>>, vector<2x128xf32>
    tpu.vector_store %arg17[%c6_79, %c0_80], %134 {strides = array<i32>} : memref<16x128xf32, #tpu.memory_space<vmem>>, vector<2x128xf32>,
    %cst_81 = arith.constant 0.000000e+00 : f32
    %136 = vector.broadcast %cst_81 : f32 to vector<2x128xf32>
    %c12 = arith.constant 12 : index
    %c0_82 = arith.constant 0 : index
    %137 = vector.load %arg17[%c12, %c0_82] : memref<16x128xf32, #tpu.memory_space<vmem>>, vector<2x128xf32>
    tpu.vector_store %arg17[%c12, %c0_82], %136 {strides = array<i32>} : memref<16x128xf32, #tpu.memory_space<vmem>>, vector<2x128xf32>,
    %c8_83 = arith.constant 8 : index
    %c0_84 = arith.constant 0 : index
    %138 = vector.load %arg17[%c8_83, %c0_84] : memref<16x128xf32, #tpu.memory_space<vmem>>, vector<4x128xf32>
    tpu.vector_store %arg17[%c8_83, %c0_84], %133 {strides = array<i32>} : memref<16x128xf32, #tpu.memory_space<vmem>>, vector<4x128xf32>,
    %c6_85 = arith.constant 6 : index
    %c0_86 = arith.constant 0 : index
    %139 = vector.load %arg17[%c6_85, %c0_86] : memref<16x128xf32, #tpu.memory_space<vmem>>, vector<4x128xf32>
    %140 = arith.truncf %139 : vector<4x128xf32> to vector<4x128xbf16>
    %c7_87 = arith.constant 7 : index
    %c0_88 = arith.constant 0 : index
    %141 = vector.load %arg17[%c7_87, %c0_88] : memref<16x128xf32, #tpu.memory_space<vmem>>, vector<4x128xf32>
    %142 = arith.truncf %141 : vector<4x128xf32> to vector<4x128xbf16>
    %c8_89 = arith.constant 8 : index
    %c0_90 = arith.constant 0 : index
    %143 = vector.load %arg17[%c8_89, %c0_90] : memref<16x128xf32, #tpu.memory_space<vmem>>, vector<4x128xf32>
    %144 = arith.truncf %143 : vector<4x128xf32> to vector<4x128xbf16>
    %c9_91 = arith.constant 9 : index
    %c0_92 = arith.constant 0 : index
    %145 = vector.load %arg17[%c9_91, %c0_92] : memref<16x128xf32, #tpu.memory_space<vmem>>, vector<4x128xf32>
    %146 = arith.truncf %145 : vector<4x128xf32> to vector<4x128xbf16>
    %c10_93 = arith.constant 10 : index
    %c0_94 = arith.constant 0 : index
    %147 = vector.load %arg17[%c10_93, %c0_94] : memref<16x128xf32, #tpu.memory_space<vmem>>, vector<4x128xf32>
    %148 = arith.truncf %147 : vector<4x128xf32> to vector<4x128xbf16>
    %149 = tpu.concatenate %140, %142, %144, %146, %148 in 1 : vector<4x128xbf16>, vector<4x128xbf16>, vector<4x128xbf16>, vector<4x128xbf16>, vector<4x128xbf16> -> vector<4x640xbf16>
    %c0_95 = arith.constant 0 : index
    %c0_96 = arith.constant 0 : index
    %150 = vector.load %arg11[%c0_95, %c0_96] : memref<640x128xbf16, #tpu.memory_space<vmem>>, vector<640x128xbf16>
    %cst_97 = arith.constant dense<0.000000e+00> : vector<4x128xf32>
    %151 = tpu.matmul %149, %150, %cst_97 {dimension_numbers = #tpu.dot_dimension_numbers<[1], [0], [0], [1], [0, 0, 1, 1], [], []>} : vector<4x640xbf16>, vector<640x128xbf16>, vector<4x128xf32> -> vector<4x128xf32>
    %c0_98 = arith.constant 0 : index
    %c0_99 = arith.constant 0 : index
    %152 = vector.load %arg12[%c0_98, %c0_99] : memref<1x128xf32, #tpu.memory_space<vmem>>, vector<1x128xf32>
    %153 = vector.broadcast %152 : vector<1x128xf32> to vector<4x128xf32>
    %154 = arith.addf %151, %153 : vector<4x128xf32>
    %cst_100 = arith.constant dense<0.000000e+00> : vector<128xf32>
    %155 = vector.multi_reduction <add>, %154, %cst_100 [0] : vector<4x128xf32> to vector<128xf32>
    %156 = vector.shape_cast %155 : vector<128xf32> to vector<1x128xf32>
    %157 = arith.mulf %154, %154 : vector<4x128xf32>
    %cst_101 = arith.constant dense<0.000000e+00> : vector<128xf32>
    %158 = vector.multi_reduction <add>, %157, %cst_101 [0] : vector<4x128xf32> to vector<128xf32>
    %159 = vector.shape_cast %158 : vector<128xf32> to vector<1x128xf32>
    %160 = tpu.concatenate %156, %159 in 0 : vector<1x128xf32>, vector<1x128xf32> -> vector<2x128xf32>
    %c0_102 = arith.constant 0 : index
    %c0_103 = arith.constant 0 : index
    %161 = vector.load %arg13[%c0_102, %c0_103] : memref<128x128xf32, #tpu.memory_space<vmem>>, vector<128x128xf32>
    %cst_104 = arith.constant dense<0.000000e+00> : vector<2x128xf32>
    %162 = tpu.matmul %160, %161, %cst_104 {dimension_numbers = #tpu.dot_dimension_numbers<[1], [0], [0], [1], [0, 0, 1, 1], [], []>} : vector<2x128xf32>, vector<128x128xf32>, vector<2x128xf32> -> vector<2x128xf32>
    %cst_105 = arith.constant 6.250000e-02 : f32
    %163 = vector.broadcast %cst_105 : f32 to vector<2x128xf32>
    %164 = arith.mulf %162, %163 : vector<2x128xf32>
    %165 = vector.extract_strided_slice %164 {offsets = [0, 0], sizes = [1, 128], strides = [1, 1]} : vector<2x128xf32> to vector<1x128xf32>
    %166 = vector.extract_strided_slice %164 {offsets = [1, 0], sizes = [1, 128], strides = [1, 1]} : vector<2x128xf32> to vector<1x128xf32>
    %167 = arith.mulf %165, %165 : vector<1x128xf32>
    %168 = arith.subf %166, %167 : vector<1x128xf32>
    %169 = vector.broadcast %165 : vector<1x128xf32> to vector<4x128xf32>
    %170 = arith.subf %154, %169 : vector<4x128xf32>
    %cst_106 = arith.constant 9.99999974E-6 : f32
    %171 = vector.broadcast %cst_106 : f32 to vector<1x128xf32>
    %172 = arith.addf %168, %171 : vector<1x128xf32>
    %173 = math.rsqrt %172 : vector<1x128xf32>
    %174 = vector.broadcast %173 : vector<1x128xf32> to vector<4x128xf32>
    %175 = arith.mulf %170, %174 : vector<4x128xf32>
    %cst_107 = arith.constant 0.000000e+00 : f32
    %176 = vector.broadcast %cst_107 : f32 to vector<4x128xf32>
    %177 = arith.maximumf %175, %176 : vector<4x128xf32>
    %c0_108 = arith.constant 0 : index
    %c0_109 = arith.constant 0 : index
    %c0_110 = arith.constant 0 : index
    %178 = vector.load %arg14[%c0_108, %c0_109, %c0_110] : memref<1x4x128xf32, #tpu.memory_space<vmem>>, vector<1x4x128xf32>
    %179 = vector.shape_cast %178 : vector<1x4x128xf32> to vector<4x128xf32>
    %180 = vector.shape_cast %177 : vector<4x128xf32> to vector<1x4x128xf32>
    tpu.vector_store %arg14[%c0_108, %c0_109, %c0_110], %180 {strides = array<i32>} : memref<1x4x128xf32, #tpu.memory_space<vmem>>, vector<1x4x128xf32>,
    return
  }
  func.func @transform_0(%arg0: i32) -> (i32, i32, i32) {
    %c0_i32 = arith.constant 0 : i32
    %c0_i32_0 = arith.constant 0 : i32
    %c0_i32_1 = arith.constant 0 : i32
    return %arg0, %c0_i32, %c0_i32_0 : i32, i32, i32
  }
  func.func @transform_1(%arg0: i32) -> (i32, i32) {
    %c0_i32 = arith.constant 0 : i32
    %c0_i32_0 = arith.constant 0 : i32
    %c0_i32_1 = arith.constant 0 : i32
    return %c0_i32, %c0_i32_0 : i32, i32
  }
  func.func @transform_2(%arg0: i32) -> (i32, i32) {
    %c0_i32 = arith.constant 0 : i32
    %c0_i32_0 = arith.constant 0 : i32
    %c0_i32_1 = arith.constant 0 : i32
    return %c0_i32, %c0_i32_0 : i32, i32
  }
  func.func @transform_3(%arg0: i32) -> (i32, i32) {
    %c0_i32 = arith.constant 0 : i32
    %c0_i32_0 = arith.constant 0 : i32
    %c0_i32_1 = arith.constant 0 : i32
    return %c0_i32, %c0_i32_0 : i32, i32
  }
  func.func @transform_4(%arg0: i32) -> (i32, i32) {
    %c0_i32 = arith.constant 0 : i32
    %c0_i32_0 = arith.constant 0 : i32
    %c0_i32_1 = arith.constant 0 : i32
    return %c0_i32, %c0_i32_0 : i32, i32
  }
  func.func @transform_5(%arg0: i32) -> (i32, i32) {
    %c0_i32 = arith.constant 0 : i32
    %c0_i32_0 = arith.constant 0 : i32
    %c0_i32_1 = arith.constant 0 : i32
    return %c0_i32, %c0_i32_0 : i32, i32
  }
  func.func @transform_6(%arg0: i32) -> (i32, i32) {
    %c0_i32 = arith.constant 0 : i32
    %c0_i32_0 = arith.constant 0 : i32
    %c0_i32_1 = arith.constant 0 : i32
    return %c0_i32, %c0_i32_0 : i32, i32
  }
  func.func @transform_7(%arg0: i32) -> (i32, i32) {
    %c0_i32 = arith.constant 0 : i32
    %c0_i32_0 = arith.constant 0 : i32
    %c0_i32_1 = arith.constant 0 : i32
    return %c0_i32, %c0_i32_0 : i32, i32
  }
  func.func @transform_8(%arg0: i32) -> (i32, i32) {
    %c0_i32 = arith.constant 0 : i32
    %c0_i32_0 = arith.constant 0 : i32
    %c0_i32_1 = arith.constant 0 : i32
    return %c0_i32, %c0_i32_0 : i32, i32
  }
  func.func @transform_9(%arg0: i32) -> (i32, i32) {
    %c0_i32 = arith.constant 0 : i32
    %c0_i32_0 = arith.constant 0 : i32
    %c0_i32_1 = arith.constant 0 : i32
    return %c0_i32, %c0_i32_0 : i32, i32
  }
  func.func @transform_10(%arg0: i32) -> (i32, i32) {
    %c0_i32 = arith.constant 0 : i32
    %c0_i32_0 = arith.constant 0 : i32
    %c0_i32_1 = arith.constant 0 : i32
    return %c0_i32, %c0_i32_0 : i32, i32
  }
  func.func @transform_11(%arg0: i32) -> (i32, i32) {
    %c0_i32 = arith.constant 0 : i32
    %c0_i32_0 = arith.constant 0 : i32
    %c0_i32_1 = arith.constant 0 : i32
    return %c0_i32, %c0_i32_0 : i32, i32
  }
  func.func @transform_12(%arg0: i32) -> (i32, i32) {
    %c0_i32 = arith.constant 0 : i32
    %c0_i32_0 = arith.constant 0 : i32
    %c0_i32_1 = arith.constant 0 : i32
    return %c0_i32, %c0_i32_0 : i32, i32
  }
  func.func @transform_13(%arg0: i32) -> (i32, i32, i32) {
    %c0_i32 = arith.constant 0 : i32
    %c0_i32_0 = arith.constant 0 : i32
    %c0_i32_1 = arith.constant 0 : i32
    return %arg0, %c0_i32, %c0_i32_0 : i32, i32, i32
  }
}

</mosaic_0001>

<bundles_post_ra>
// kernel: forward.1
= control target key start
LH: loop header
LB: loop body
LE: loop exit
PB: predicated region body
PF: predicated region fallthrough
CT: control target
= control target key end

     0   :  { %s4849_s0 = inlined_call_operand.vmem [shape: f32[2,22,128], index: 0, kind: input, shape index: {}]   ;;  %s4850_s1 = inlined_call_operand.vmem [shape: bf16[896,128], index: 1, kind: input, shape index: {}]   ;;  %s4851_s2 = inlined_call_operand.vmem [shape: f32[1,128], index: 2, kind: input, shape index: {}]   ;;  %s4852_s3 = inlined_call_operand.hbm [shape: f32[128,128], index: 3, kind: input, shape index: {}]   ;;  %s4853_s4 = inlined_call_operand.hbm [shape: bf16[512,128], index: 4, kind: input, shape index: {}]   ;;  %s4854_s5 = inlined_call_operand.vmem [shape: f32[1,128], index: 5, kind: input, shape index: {}]   ;;  %s4855_s6 = inlined_call_operand.hbm [shape: f32[128,128], index: 6, kind: input, shape index: {}]   ;;  %s4856_s7 = inlined_call_operand.hbm [shape: bf16[512,128], index: 7, kind: input, shape index: {}]   ;;  %s4857_s8 = inlined_call_operand.vmem [shape: f32[1,128], index: 8, kind: input, shape index: {}]   ;;  %s4858_s9 = inlined_call_operand.hbm [shape: f32[128,128], index: 9, kind: input, shape index: {}]   ;;  %s4859_s10 = inlined_call_operand.vmem [shape: bf16[640,128], index: 10, kind: input, shape index: {}]   ;;  %s4860_s11 = inlined_call_operand.vmem [shape: f32[1,128], index: 11, kind: input, shape index: {}]   ;;  %s4861_s12 = inlined_call_operand.hbm [shape: f32[128,128], index: 12, kind: input, shape index: {}]   ;;  %s4862_s13 = inlined_call_operand.vmem [shape: f32[2,4,128], index: 13, kind: output, shape index: {}]  }
   0x1   :  { %4866 = sst [smem:[#allocation20_spill]] %s4862_s13 }
   0x2   :  { %18 = vsyncpa [#allocation6], 0 }
   0x3   :  { %19 = vsyncpa [#allocation8], 0 }
   0x4   :  { %20 = vsyncpa [#allocation11], 0 }
   0x5   :  { %21 = vsyncpa [#allocation14], 0  ;;  %s4212_s25 = smov 0  }
   0x6 LB: > { %4867 = sst [smem:[#allocation19_spill]] %s4127_s25  ;;  %s4129_s26 = smov [#allocation7]   ;;  %s4127_s25 = sphi %s4212_s25, %s27_s25  }
   0x7   : > { %s367_s27 = sshll.u32 %s4129_s26, 4  ;;  %s4218_s28 = sadd.s32 4294967295, %s4127_s25   ;;  %s4223_s27 = int_to_ptr.vmem [resolvable:$true] %s367_s27 }
   0x8   : > { %p2949_p0 = scmp.ge.s32.totalorder %s4127_s25, 1  ;;  %p336_p1 = scmp.lt.s32.totalorder %s4127_s25, 3 }
   0x9   : > { %p4864_p2 = scmp.eq.s32.totalorder %s4218_s28, 0  ;;  %s4130_s30 = smov [#allocation10]  }
   0xa   : > { %p4225_p3 = pnand %p2949_p0, %p336_p1  ;;  %s396_s14 = sshll.u32 %s4130_s30, 4  ;;  %s4231_s14 = int_to_ptr.vmem [resolvable:$true] %s396_s14 }
   0xb   : > { %s4131_s16 = smov [#allocation5]   ;;  %s3937_s20 = scalar_lea.hbm %s4853_s4, 4096 }
   0xc   : > { %s4868_s29 = scalar_select %p4225_p3, 1, 0 }
   0xd   : > { %p3717_p4 = pneg %p4225_p3  ;;  %s354_s17 = sshll.u32 %s4131_s16, 4  ;;  %s4239_s17 = int_to_ptr.vmem [resolvable:$true] %s354_s17 }
   0xe   : > { %p3938_p6 = scmp.ne.s32.totalorder %s4853_s4, %s3937_s20  ;;  %p3944_p10 = scmp.lt.u32.totalorder %s3937_s20, %s4853_s4 }
   0xf   : > { %p4235_p5 = pnand %p4864_p2, %p3717_p4 }
  0x11   : > { %p4249_p7 = pneg %p4235_p5 }
  0x13   : > { %p3940_p8 = pnand %p4249_p7, %p3938_p6 }
  0x15   : > { %p3941_p9 = pneg %p3940_p8 }
  0x17   : > { %p3946_p11 = pnand %p3944_p10, %p3941_p9 }
  0x19   : > { %3949 = shalt.err (!%p3946_p11)
}
  0x1a   : > { %s3950_s30 = scalar_lea.vmem %s4223_s27, 4096  ;;  %p3958_p1 = scmp.lt.s32.totalorder %s4223_s27, %s4223_s27 }
  0x1b   : > { %p3951_p12 = scmp.ne.s32.totalorder %s4223_s27, %s3950_s30  ;;  %p3959_p4 = scmp.lt.s32.totalorder %s3950_s30, %s3950_s30 }
  0x1d   : > { %p3953_p13 = pnand %p3951_p12, %p4249_p7  ;;  %p3960_p6 = por %p3959_p4, %p3958_p1 }
  0x1f   : > { %p3954_p0 = pneg %p3953_p13 }
  0x21   : > { %p3961_p8 = pnand %p3960_p6, %p3954_p0 }
  0x23   : > { %3964 = shalt.err (!%p3961_p8)
}
  0x24   : > { %s4132_s16 = smov 64   ;;  %s4133_s18 = smov 4  }
  0x25   : > { %3723 = dma.hbm_to_vmem [thread:$0]  (!%p4235_p5), %s4853_s4, 4096, %s4223_s27, [#allocation8], %s4132_s16, %s4132_s16, %s4133_s18  }
  0x26   : > { %s3965_s24 = scalar_lea.hbm %s4856_s7, 4096 }
  0x27   : > { %p3966_p9 = scmp.ne.s32.totalorder %s4856_s7, %s3965_s24  ;;  %p3972_p12 = scmp.lt.u32.totalorder %s3965_s24, %s4856_s7 }
  0x29   : > { %p3968_p10 = pnand %p3966_p9, %p4249_p7 }
  0x2b   : > { %p3969_p11 = pneg %p3968_p10 }
  0x2d   : > { %p3974_p13 = pnand %p3972_p12, %p3969_p11 }
  0x2f   : > { %3977 = shalt.err (!%p3974_p13)
}
  0x30   : > { %s3978_s27 = scalar_lea.vmem %s4231_s14, 4096  ;;  %p3986_p6 = scmp.lt.s32.totalorder %s4231_s14, %s4231_s14 }
  0x31   : > { %p3979_p0 = scmp.ne.s32.totalorder %s4231_s14, %s3978_s27  ;;  %p3987_p8 = scmp.lt.s32.totalorder %s3978_s27, %s3978_s27 }
  0x33   : > { %p3981_p1 = pnand %p3979_p0, %p4249_p7  ;;  %p3988_p9 = por %p3987_p8, %p3986_p6 }
  0x35   : > { %p3982_p4 = pneg %p3981_p1 }
  0x37   : > { %p3989_p10 = pnand %p3988_p9, %p3982_p4 }
  0x39   : > { %3992 = shalt.err (!%p3989_p10)
}
  0x3a   : > { %3729 = dma.hbm_to_vmem [thread:$0]  (!%p4235_p5), %s4856_s7, 4096, %s4231_s14, [#allocation11], %s4132_s16, %s4132_s16, %s4133_s18  }
  0x3b   : > { %s3993_s21 = scalar_lea.hbm %s4852_s3, 2048 }
  0x3c   : > { %p3994_p11 = scmp.ne.s32.totalorder %s4852_s3, %s3993_s21  ;;  %p4000_p0 = scmp.lt.u32.totalorder %s3993_s21, %s4852_s3 }
  0x3e   : > { %p3996_p12 = pnand %p3994_p11, %p4249_p7 }
  0x40   : > { %p3997_p13 = pneg %p3996_p12 }
  0x42   : > { %p4002_p1 = pnand %p4000_p0, %p3997_p13 }
  0x44   : > { %4005 = shalt.err (!%p4002_p1)
}
  0x45   : > { %s4006_s14 = scalar_lea.vmem %s4239_s17, 2048  ;;  %p4014_p9 = scmp.lt.s32.totalorder %s4239_s17, %s4239_s17 }
  0x46   : > { %p4007_p4 = scmp.ne.s32.totalorder %s4239_s17, %s4006_s14  ;;  %p4015_p10 = scmp.lt.s32.totalorder %s4006_s14, %s4006_s14 }
  0x48   : > { %p4009_p6 = pnand %p4007_p4, %p4249_p7  ;;  %p4016_p11 = por %p4015_p10, %p4014_p9 }
  0x4a   : > { %p4010_p8 = pneg %p4009_p6 }
  0x4c   : > { %p4017_p12 = pnand %p4016_p11, %p4010_p8 }
  0x4e   : > { %4020 = shalt.err (!%p4017_p12)
}
  0x4f   : > { %s4134_s16 = smov 128   ;;  %s4135_s18 = smov 8  }
  0x50   : > { %3720 = dma.hbm_to_vmem [thread:$0]  (!%p4235_p5), %s4852_s3, 2048, %s4239_s17, [#allocation6], %s4134_s16, %s4134_s16, %s4135_s18  }
  0x51   : > { %s4136_s25 = smov [#allocation9]   ;;  %s4137_s20 = smov [#allocation12]  }
  0x52   : > { %s383_s19 = sshll.u32 %s4136_s25, 4  ;;  %s412_s21 = sshll.u32 %s4137_s20, 4  ;;  %s384_s19 = int_to_ptr.vmem [resolvable:$true] %s383_s19  ;;  %s4319_s21 = int_to_ptr.vmem [resolvable:$true] %s412_s21 }
  0x53   : > { %s4021_s26 = scalar_lea.hbm %s4855_s6, 2048 }
  0x54   : > { %p4022_p13 = scmp.ne.s32.totalorder %s4855_s6, %s4021_s26  ;;  %p4028_p4 = scmp.lt.u32.totalorder %s4021_s26, %s4855_s6 }
  0x56   : > { %p4024_p0 = pnand %p4022_p13, %p4249_p7 }
  0x58   : > { %p4025_p1 = pneg %p4024_p0 }
  0x5a   : > { %p4030_p6 = pnand %p4028_p4, %p4025_p1 }
  0x5c   : > { %4033 = shalt.err (!%p4030_p6)
}
  0x5d   : > { %s4034_s13 = scalar_lea.vmem %s384_s19, 2048  ;;  %p4042_p11 = scmp.lt.s32.totalorder %s384_s19, %s384_s19 }
  0x5e   : > { %p4035_p8 = scmp.ne.s32.totalorder %s384_s19, %s4034_s13  ;;  %p4043_p12 = scmp.lt.s32.totalorder %s4034_s13, %s4034_s13 }
  0x60   : > { %p4037_p9 = pnand %p4035_p8, %p4249_p7  ;;  %p4044_p2 = por %p4043_p12, %p4042_p11 }
  0x62   : > { %p4038_p10 = pneg %p4037_p9 }
  0x64   : > { %p4045_p3 = pnand %p4044_p2, %p4038_p10 }
  0x66   : > { %4048 = shalt.err (!%p4045_p3)
}
  0x67   : > { %3726 = dma.hbm_to_vmem [thread:$0]  (!%p4235_p5), %s4855_s6, 2048, %s384_s19, [#allocation8], %s4134_s16, %s4134_s16, %s4135_s18  }
  0x68   : > { %s4049_s26 = scalar_lea.hbm %s4858_s9, 2048 }
  0x69   : > { %p4050_p13 = scmp.ne.s32.totalorder %s4858_s9, %s4049_s26  ;;  %p4056_p0 = scmp.lt.u32.totalorder %s4049_s26, %s4858_s9 }
  0x6b   : > { %p4052_p2 = pnand %p4050_p13, %p4249_p7 }
  0x6d   : > { %p4053_p3 = pneg %p4052_p2 }
  0x6f   : > { %p4058_p1 = pnand %p4056_p0, %p4053_p3 }
  0x71   : > { %4061 = shalt.err (!%p4058_p1)
}
  0x72   : > { %s4062_s19 = scalar_lea.vmem %s4319_s21, 2048  ;;  %p4070_p9 = scmp.lt.s32.totalorder %s4319_s21, %s4319_s21 }
  0x73   : > { %p4063_p4 = scmp.ne.s32.totalorder %s4319_s21, %s4062_s19  ;;  %p4071_p10 = scmp.lt.s32.totalorder %s4062_s19, %s4062_s19 }
  0x75   : > { %p4065_p6 = pnand %p4063_p4, %p4249_p7  ;;  %p4072_p11 = por %p4071_p10, %p4070_p9 }
  0x77   : > { %p4066_p8 = pneg %p4065_p6 }
  0x79   : > { %p4073_p12 = pnand %p4072_p11, %p4066_p8 }
  0x7b   : > { %4076 = shalt.err (!%p4073_p12)
}
  0x7c   : > { %3732 = dma.hbm_to_vmem [thread:$0]  (!%p4235_p5), %s4858_s9, 2048, %s4319_s21, [#allocation11], %s4134_s16, %s4134_s16, %s4135_s18  }
  0x7d   : > { %s4138_s20 = smov [#allocation13]   ;;  %s4077_s30 = scalar_lea.hbm %s4861_s12, 2048 }
  0x7e   : > { %s431_s22 = sshll.u32 %s4138_s20, 4  ;;  %p4078_p13 = scmp.ne.s32.totalorder %s4861_s12, %s4077_s30  ;;  %s432_s22 = int_to_ptr.vmem [resolvable:$true] %s431_s22 }
  0x7f   : > { %p4084_p0 = scmp.lt.u32.totalorder %s4077_s30, %s4861_s12 }
  0x80   : > { %p4080_p2 = pnand %p4078_p13, %p4249_p7 }
  0x82   : > { %p4081_p3 = pneg %p4080_p2 }
  0x84   : > { %p4086_p1 = pnand %p4084_p0, %p4081_p3 }
  0x86   : > { %4089 = shalt.err (!%p4086_p1)
}
  0x87   : > { %s4090_s21 = scalar_lea.vmem %s432_s22, 2048  ;;  %p4098_p9 = scmp.lt.s32.totalorder %s432_s22, %s432_s22 }
  0x88   : > { %p4091_p4 = scmp.ne.s32.totalorder %s432_s22, %s4090_s21  ;;  %p4099_p10 = scmp.lt.s32.totalorder %s4090_s21, %s4090_s21 }
  0x8a   : > { %p4093_p6 = pnand %p4091_p4, %p4249_p7  ;;  %p4100_p11 = por %p4099_p10, %p4098_p9 }
  0x8c   : > { %p4094_p8 = pneg %p4093_p6 }
  0x8e   : > { %p4101_p12 = pnand %p4100_p11, %p4094_p8 }
  0x90   : > { %4104 = shalt.err (!%p4101_p12)
}
  0x91   : > { %3735 = dma.hbm_to_vmem [thread:$0]  (!%p4235_p5), %s4861_s12, 2048, %s432_s22, [#allocation14], %s4134_s16, %s4134_s16, %s4135_s18  }
  0x92   : > { %p4871_p13 = scmp.ne.s32.totalorder %s4868_s29, 0 }
  0x93   : > { %p4872_p7 = scmp.eq.s32.totalorder (!%p4871_p13), %s4218_s28, 0 }
  0x94   : > { %455 = sbr.rel (%p4871_p13) target bundleno = 2191 (0x88f), region = 72 }
  0x9b   : > { %4110 = dma.done.wait (%p4872_p7), [#allocation6], 2048   ;;  %p4873_p2 = pmov %p4872_p7 }
  0x9d   : > { %4112 = vsyncadd (%p4873_p2), [#allocation6], 4294965248  ;;  %p4874_p3 = pmov %p4873_p2 }
  0x9e   : > { %p4875_p0 = pmov %p4873_p2 }
  0x9f   : > { %4114 = dma.done.wait (%p4874_p3), [#allocation8], 6144  }
  0xa0   : > { %4116 = vsyncadd (%p4875_p0), [#allocation8], 4294961152  ;;  %p4876_p1 = pmov %p4875_p0 }
  0xa1   : > { %p4877_p5 = pmov %p4875_p0 }
  0xa2   : > { %4118 = dma.done.wait (%p4876_p1), [#allocation11], 6144  }
  0xa3   : > { %4120 = vsyncadd (%p4877_p5), [#allocation11], 4294961152  ;;  %p4878_p4 = pmov %p4875_p0 }
  0xa4   : > { %p4879_p6 = pmov %p4875_p0 }
  0xa5   : > { %4122 = dma.done.wait (%p4878_p4), [#allocation14], 2048  }
  0xa6   : > { %4124 = vsyncadd (%p4879_p6), [#allocation14], 4294965248  ;;  %v4139_v0 = vmov 0.0   ;;  %v3769_v1 = vld [vmem:[%s4850_s1 + $0x40] sm:$0xff]   ;;  %v3773_v5 = vld [vmem:[%s4850_s1 + $0x48] sm:$0xff]   ;;  %p518_p8 = scmp.lt.s32.totalorder %s4218_s28, 1 }
  0xa7   : > { %1294 = vst [vmem:[#allocation2 + $0x7] sm:$0x1] %v4139_v0  ;;  %1295 = vst [vmem:[#allocation2 + $0x18] sm:$0x1] %v4139_v0  ;;  %v3770_v2 = vld [vmem:[%s4850_s1] sm:$0xff]   ;;  %3132 = vmatprep.subr.bf16.mxu0 %v3769_v1  ;;  %v3774_v6 = vld [vmem:[%s4850_s1 + $0x8] sm:$0xff]  }
  0xa8   : > { %1772 = vst [vmem:[#allocation3 + $0x7] sm:$0x1] %v4139_v0  ;;  %1773 = vst [vmem:[#allocation3 + $0x10] sm:$0x1] %v4139_v0  ;;  %v3771_v3 = vld [vmem:[%s4850_s1 + $0xc0] sm:$0xff]   ;;  %3133 = vmatpush3.bf16.msra.mxu0 %v3770_v2  ;;  %v3775_v7 = vld [vmem:[%s4850_s1 + $0xc8] sm:$0xff]  }
  0xa9   : > { %2252 = vst [vmem:[#allocation4 + $0x6] sm:$0x3] %v4139_v0  ;;  %2253 = vst [vmem:[#allocation4 + $0xc] sm:$0x3] %v4139_v0  ;;  %v3772_v4 = vld [vmem:[%s4850_s1 + $0x80] sm:$0xff]   ;;  %3154 = vmatprep.subr.bf16.mxu1 %v3771_v3  ;;  %3134 = vmatprep.subr.bf16.mxu0 %v3773_v5  ;;  %v3776_v8 = vld [vmem:[%s4850_s1 + $0x88] sm:$0xff]  }
  0xaa   : > { %3155 = vmatpush3.bf16.msra.mxu1 %v3772_v4  ;;  %v3777_v9 = vld [vmem:[%s4850_s1 + $0x50] sm:$0xff]   ;;  %v3781_v13 = vld [vmem:[%s4850_s1 + $0x58] sm:$0xff]   ;;  %v3785_v17 = vld [vmem:[%s4850_s1 + $0x60] sm:$0xff]   ;;  %s4883_s28 = smov (!%p518_p8, %s4218_s28), 1  ;;  %vm4140_vm0 = vmmov 0   ;;  %vm1184_vm1 = vcmask 1040384  }
  0xab   : > { %3156 = vmatprep.subr.bf16.mxu1 %v3775_v7  ;;  %v3778_v10 = vld [vmem:[%s4850_s1 + $0x10] sm:$0xff]   ;;  %v3782_v14 = vld [vmem:[%s4850_s1 + $0x18] sm:$0xff]   ;;  %v3786_v18 = vld [vmem:[%s4850_s1 + $0x20] sm:$0xff]   ;;  %s3692_s25 = smul.u32 24, %s4883_s28  ;;  %vm2130_vm2 = vcmask 1043456   ;;  %s2965_s23 = sshll.u32 %s4883_s28, 2 }
  0xac   : > { %3135 = vmatpush3.bf16.msra.mxu0 %v3774_v6  ;;  %v3779_v11 = vld [vmem:[%s4850_s1 + $0xd0] sm:$0xff]   ;;  %v3783_v15 = vld [vmem:[%s4850_s1 + $0xd8] sm:$0xff]   ;;  %v3787_v19 = vld [vmem:[%s4850_s1 + $0xe0] sm:$0xff]   ;;  %s4880_s20 = sld [smem:[#allocation20_spill]] }
  0xad   : > { %3136 = vmatprep.subr.bf16.mxu0 %v3777_v9  ;;  %v3780_v12 = vld [vmem:[%s4850_s1 + $0x90] sm:$0xff]   ;;  %v3784_v16 = vld [vmem:[%s4850_s1 + $0x98] sm:$0xff]   ;;  %v3788_v20 = vld [vmem:[%s4850_s1 + $0xa0] sm:$0xff]   ;;  %s4508_s14 = scalar_lea.vmem %s4849_s0, %s3692_s25 }
  0xae   : > { %3157 = vmatpush3.bf16.msra.mxu1 %v3776_v8  ;;  %v3789_v21 = vld [vmem:[%s4850_s1 + $0x68] sm:$0xff]   ;;  %v3793_v25 = vld [vmem:[%s4850_s1 + $0x70] sm:$0xff]   ;;  %v3797_v29 = vld [vmem:[%s4850_s1 + $0x78] sm:$0xff]  }
  0xaf   : > { %3158 = vmatprep.subr.bf16.mxu1 %v3779_v11  ;;  %v3790_v22 = vld [vmem:[%s4850_s1 + $0x28] sm:$0xff]   ;;  %v3794_v26 = vld [vmem:[%s4850_s1 + $0x30] sm:$0xff]   ;;  %v3798_v30 = vld [vmem:[%s4850_s1 + $0x38] sm:$0xff]  }
  0xb0   : > { %3137 = vmatpush3.bf16.msra.mxu0 %v3778_v10  ;;  %v3791_v23 = vld [vmem:[%s4850_s1 + $0xe8] sm:$0xff]   ;;  %v3795_v27 = vld [vmem:[%s4850_s1 + $0xf0] sm:$0xff]   ;;  %v3799_v31 = vld [vmem:[%s4850_s1 + $0xf8] sm:$0xff]  }
  0xb1   : > { %3138 = vmatprep.subr.bf16.mxu0 %v3781_v13  ;;  %v3792_v24 = vld [vmem:[%s4850_s1 + $0xa8] sm:$0xff]   ;;  %v3796_v28 = vld [vmem:[%s4850_s1 + $0xb0] sm:$0xff]   ;;  %v3800_v35 = vld [vmem:[%s4850_s1 + $0xb8] sm:$0xff]  }
  0xb2   : > { %3159 = vmatpush3.bf16.msra.mxu1 %v3780_v12  ;;  %v531_v32 = vld [vmem:[%s4508_s14 + $0x1] sm:$0xff]  ;;  %v532_v33 = vld [vmem:[%s4508_s14 + $0x9] sm:$0xff]  ;;  %v3810_v54 = vld [vmem:[%s4850_s1 + $0x158] sm:$0xff]   ;;  %s526_s22 = scalar_lea.vmem %s4880_s20, %s2965_s23 }
  0xb3   : > { %3160 = vmatprep.subr.bf16.mxu1 %v3783_v15  ;;  %v533_v34 = vpack.c.bf16 %v532_v33, %v531_v32  ;;  %v528_v36 = vld [vmem:[%s4508_s14] sm:$0xff]  ;;  %v529_v37 = vld [vmem:[%s4508_s14 + $0x8] sm:$0xff]  ;;  %v3807_v51 = vld [vmem:[%s4850_s1 + $0x150] sm:$0xff]  }
  0xb4   : > { %3139 = vmatpush3.bf16.msra.mxu0 %v3782_v14  ;;  %v530_v38 = vpack.c.bf16 %v529_v37, %v528_v36  ;;  %v3801_v39 = vld [vmem:[%s4850_s1 + $0x140] sm:$0xff]   ;;  %v538_v41 = vld [vmem:[%s4508_s14 + $0xb] sm:$0xff]  ;;  %v3811_v55 = vld [vmem:[%s4850_s1 + $0x118] sm:$0xff]  }
  0xb5   : > { %3140 = vmatprep.subr.bf16.mxu0 %v3785_v17  ;;  %1036 = vmatprep.mubr.bf16.mxu0 %v533_v34  ;;  %v537_v40 = vld [vmem:[%s4508_s14 + $0x3] sm:$0xff]  ;;  %v3808_v52 = vld [vmem:[%s4850_s1 + $0x110] sm:$0xff]   ;;  %v3812_v57 = vld [vmem:[%s4850_s1 + $0x198] sm:$0xff]   ;;  %v4141_v17 = vmov 0.0|0.0  }
  0xb6   : > { %3161 = vmatpush3.bf16.msra.mxu1 %v3784_v16  ;;  %v539_v42 = vpack.c.bf16 %v538_v41, %v537_v40  ;;  %v3802_v43 = vld [vmem:[%s4850_s1 + $0x100] sm:$0xff]   ;;  %v535_v45 = vld [vmem:[%s4508_s14 + $0xa] sm:$0xff]  ;;  %v3822_v2 = vld [vmem:[%s4850_s1 + $0x178] sm:$0xff]  }
  0xb7   : > { %3162 = vmatprep.subr.bf16.mxu1 %v3787_v19  ;;  %v534_v44 = vld [vmem:[%s4508_s14 + $0x2] sm:$0xff]  ;;  %v3809_v53 = vld [vmem:[%s4850_s1 + $0x190] sm:$0xff]   ;;  %v3823_v6 = vld [vmem:[%s4850_s1 + $0x138] sm:$0xff]  }
  0xb8   : > { %3141 = vmatpush3.bf16.msra.mxu0 %v3786_v18  ;;  %1077 = vmatprep.mubr.bf16.mxu1 %v539_v42  ;;  %v536_v46 = vpack.c.bf16 %v535_v45, %v534_v44  ;;  %v3803_v47 = vld [vmem:[%s4850_s1 + $0x180] sm:$0xff]   ;;  %v3804_v48 = vld [vmem:[%s4850_s1 + $0x148] sm:$0xff]   ;;  %v3819_v62 = vld [vmem:[%s4850_s1 + $0x170] sm:$0xff]  }
  0xb9   : > { %3142 = vmatprep.subr.bf16.mxu0 %v3789_v21  ;;  %v3805_v49 = vld [vmem:[%s4850_s1 + $0x108] sm:$0xff]   ;;  %v3813_v56 = vld [vmem:[%s4850_s1 + $0x160] sm:$0xff]   ;;  %v3820_v1 = vld [vmem:[%s4850_s1 + $0x130] sm:$0xff]  }
  0xba   : > { %3163 = vmatpush3.bf16.msra.mxu1 %v3788_v20  ;;  %v3806_v50 = vld [vmem:[%s4850_s1 + $0x188] sm:$0xff]   ;;  %v3814_v58 = vld [vmem:[%s4850_s1 + $0x120] sm:$0xff]   ;;  %v3821_v5 = vld [vmem:[%s4850_s1 + $0x1b0] sm:$0xff]  }
  0xbb   : > { %3164 = vmatprep.subr.bf16.mxu1 %v3791_v23  ;;  %v3816_v59 = vld [vmem:[%s4850_s1 + $0x168] sm:$0xff]   ;;  %v3815_v60 = vld [vmem:[%s4850_s1 + $0x1a0] sm:$0xff]   ;;  %v3824_v10 = vld [vmem:[%s4850_s1 + $0x1b8] sm:$0xff]  }
  0xbc   : > { %3143 = vmatpush3.bf16.msra.mxu0 %v3790_v22  ;;  %v3817_v61 = vld [vmem:[%s4850_s1 + $0x128] sm:$0xff]   ;;  %v1187_v16 = vld [vmem:[#allocation5 + $0x8] sm:$0xff]  ;;  %v1188_v19 = vld [vmem:[#allocation5 + $0x10] sm:$0xff] }
  0xbd   : > { %3144 = vmatprep.subr.bf16.mxu0 %v3793_v25  ;;  %v3818_v63 = vld [vmem:[%s4850_s1 + $0x1a8] sm:$0xff]   ;;  %v1189_v20 = vld [vmem:[#allocation5 + $0x18] sm:$0xff]  ;;  %v1191_v23 = vld [vmem:[#allocation5 + $0x28] sm:$0xff] }
  0xbe   : > { %3165 = vmatpush3.bf16.msra.mxu1 %v3792_v24  ;;  %v543_v3 = vld [vmem:[%s4508_s14 + $0x5] sm:$0xff]  ;;  %v544_v4 = vld [vmem:[%s4508_s14 + $0xd] sm:$0xff]  ;;  %v3600_v21 = vpack.c.bf16 %v1189_v20, %v1188_v19  ;;  %v1192_v25 = vld [vmem:[#allocation5 + $0x30] sm:$0xff] }
  0xbf   : > { %3166 = vmatprep.subr.bf16.mxu1 %v3795_v27  ;;  %v545_v7 = vpack.c.bf16 %v544_v4, %v543_v3  ;;  %v540_v8 = vld [vmem:[%s4508_s14 + $0x4] sm:$0xff]  ;;  %v541_v9 = vld [vmem:[%s4508_s14 + $0xc] sm:$0xff]  ;;  %v1200_v36 = vld [vmem:[#allocation5 + $0x70] sm:$0xff] }
  0xc0   : > { %3145 = vmatpush3.bf16.msra.mxu0 %v3794_v26  ;;  %v546_v11 = vld [vmem:[%s4508_s14 + $0x6] sm:$0xff]  ;;  %v547_v12 = vld [vmem:[%s4508_s14 + $0xe] sm:$0xff]  ;;  %v542_v13 = vpack.c.bf16 %v541_v9, %v540_v8  ;;  %v2966_v41 = vld [vmem:[%s4851_s2] ss:$0 sm:$0xff] }
  0xc1   : > { %3146 = vmatprep.subr.bf16.mxu0 %v3797_v29  ;;  %v548_v14 = vpack.c.bf16 %v547_v12, %v546_v11  ;;  %v1186_v15 = vld [vmem:[#allocation5] sm:$0xff]  ;;  %v1193_v26 = vld [vmem:[#allocation5 + $0x38] sm:$0xff]  ;;  %v1195_v29 = vld [vmem:[#allocation5 + $0x48] sm:$0xff] }
  0xc2   : > { %3167 = vmatpush3.bf16.msra.mxu1 %v3796_v28  ;;  %v3597_v18 = vpack.c.bf16 %v1187_v16, %v1186_v15  ;;  %v1190_v22 = vld [vmem:[#allocation5 + $0x20] sm:$0xff]  ;;  %v3606_v27 = vpack.c.bf16 %v1193_v26, %v1192_v25  ;;  %v1197_v32 = vld [vmem:[#allocation5 + $0x58] sm:$0xff] }
  0xc3   : > { %3168 = vmatprep.subr.bf16.mxu1 %v3799_v31  ;;  %v3603_v24 = vpack.c.bf16 %v1191_v23, %v1190_v22  ;;  %v1194_v28 = vld [vmem:[#allocation5 + $0x40] sm:$0xff]  ;;  %v1196_v31 = vld [vmem:[#allocation5 + $0x50] sm:$0xff] }
  0xc4   : > { %3147 = vmatpush3.bf16.msra.mxu0 %v3798_v30  ;;  %v3609_v30 = vpack.c.bf16 %v1195_v29, %v1194_v28  ;;  %v3612_v33 = vpack.c.bf16 %v1197_v32, %v1196_v31  ;;  %v1198_v34 = vld [vmem:[#allocation5 + $0x60] sm:$0xff]  ;;  %v3830_v31 = vld [vmem:[#allocation7 + $0xc8] sm:$0xff]  }
  0xc5   : > { %3176 = vmatprep.subr.bf16.mxu0 %v3801_v39  ;;  %v3825_v26 = vld [vmem:[#allocation7 + $0x40] sm:$0xff]   ;;  %v3831_v32 = vld [vmem:[#allocation7 + $0x8] sm:$0xff]  }
  0xc6   : > { %3169 = vmatpush3.bf16.msra.mxu1 %v3800_v35  ;;  %v1199_v35 = vld [vmem:[#allocation5 + $0x68] sm:$0xff]  ;;  %v3827_v28 = vld [vmem:[#allocation7] sm:$0xff]  }
  0xc7   : > { %3416 = vmatprep.subr.bf16.mxu1 %v4139_v0  ;;  %1037 = vmatmul.mubr.bf16.vlgmr.msra.gmra.mrb[0].mxu0 %v530_v38  ;;  %v3615_v37 = vpack.c.bf16 %v1199_v35, %v1198_v34  ;;  %v1201_v38 = vld [vmem:[#allocation5 + $0x78] sm:$0xff]  ;;  %v3828_v29 = vld [vmem:[#allocation7 + $0x80] sm:$0xff]   ;;  %v3833_v34 = vld [vmem:[#allocation7 + $0x50] sm:$0xff]  }
  0xc8   : > { %3177 = vmatpush3.bf16.msra.mxu0 %v3802_v43  ;;  %1118 = vmatprep.mubr.bf16.mxu0 %v545_v7  ;;  %v3618_v39 = vpack.c.bf16 %v1201_v38, %v1200_v36  ;;  %v3834_v35 = vld [vmem:[#allocation7 + $0xd0] sm:$0xff]   ;;  %v3837_v38 = vld [vmem:[#allocation7 + $0x58] sm:$0xff]  }
  0xc9   : > { %1078 = vmatmul.mubr.bf16.vlgmr.msra.gmra.mrb[0].mxu1 %v536_v46  ;;  %3178 = vmatprep.subr.bf16.mxu0 %v3804_v48  ;;  %v3835_v36 = vld [vmem:[#allocation7 + $0x10] sm:$0xff]  }
  0xca   : > { %3417 = vmatpush3.bf16.msra.mxu1 %v3803_v47  ;;  %3432 = vmatprep.mubr.msk.bf16.mxu1 %vm4140_vm0, %v4139_v0 }
  0xcb   : > { %3418 = vmatprep.subr.bf16.mxu1 %v4139_v0 }
  0xcc   : > { %3179 = vmatpush3.bf16.msra.mxu0 %v3805_v49 }
  0xcd   : > { %3180 = vmatprep.subr.bf16.mxu0 %v3807_v51 }
  0xce   : > { %3419 = vmatpush3.bf16.msra.mxu1 %v3806_v50 }
  0xcf   : > { %3420 = vmatprep.subr.bf16.mxu1 %v4139_v0 }
  0xd0   : > { %3181 = vmatpush3.bf16.msra.mxu0 %v3808_v52 }
  0xd1   : > { %3182 = vmatprep.subr.bf16.mxu0 %v3810_v54 }
  0xd2   : > { %3421 = vmatpush3.bf16.msra.mxu1 %v3809_v53 }
  0xd3   : > { %3422 = vmatprep.subr.bf16.mxu1 %v4139_v0 }
  0xd4   : > { %3183 = vmatpush3.bf16.msra.mxu0 %v3811_v55 }
  0xd5   : > { %3184 = vmatprep.subr.bf16.mxu0 %v3813_v56 }
  0xd6   : > { %3423 = vmatpush3.bf16.msra.mxu1 %v3812_v57 }
  0xd7   : > { %3424 = vmatprep.subr.bf16.mxu1 %v4139_v0 }
  0xd8   : > { %3185 = vmatpush3.bf16.msra.mxu0 %v3814_v58 }
  0xd9   : > { %3186 = vmatprep.subr.bf16.mxu0 %v3816_v59 }
  0xda   : > { %3425 = vmatpush3.bf16.msra.mxu1 %v3815_v60 }
  0xdb   : > { %3426 = vmatprep.subr.bf16.mxu1 %v4139_v0 }
  0xdc   : > { %3187 = vmatpush3.bf16.msra.mxu0 %v3817_v61 }
  0xdd   : > { %3188 = vmatprep.subr.bf16.mxu0 %v3819_v62 }
  0xde   : > { %3427 = vmatpush3.bf16.msra.mxu1 %v3818_v63 }
  0xdf   : > { %3428 = vmatprep.subr.bf16.mxu1 %v4139_v0 }
  0xe0   : > { %3189 = vmatpush3.bf16.msra.mxu0 %v3820_v1 }
  0xe1   : > { %3190 = vmatprep.subr.bf16.mxu0 %v3822_v2 }
  0xe2   : > { %3429 = vmatpush3.bf16.msra.mxu1 %v3821_v5 }
  0xe3   : > { %3430 = vmatprep.subr.bf16.mxu1 %v4139_v0 }
  0xe4   : > { %3191 = vmatpush3.bf16.msra.mxu0 %v3823_v6 }
  0xe5   : > { %3596 = vmatprep.subr.bf16.mxu0 %v4141_v17 }
  0xe6   : > { %3431 = vmatpush3.bf16.msra.mxu1 %v3824_v10 }
  0xe7   : > { %1119 = vmatmul.mubr.bf16.vlgmr.msra.gmra.mrb[4].mxu0 %v542_v13  ;;  %3224 = vmatprep.subr.bf16.mxu1 %v3825_v26 }
  0xe8   : > { %3468 = vmatprep.mubr.msk.f32.mxu0 %vm4140_vm0, %v4139_v0  ;;  %3598 = vmatpush3.bf16.msra.mxu0 %v3597_v18 }
  0xe9   : > { %3433 = vmatmul.mubr.bf16.vlgmr.msra.gmra.mrb[4].mxu1 %v548_v14  ;;  %3599 = vmatprep.subr.bf16.mxu0 %v4141_v17 }
  0xea   : > { %3225 = vmatpush3.bf16.msra.mxu1 %v3827_v28  ;;  %v1670_v28 = vld [vmem:[#allocation9 + $0x18] sm:$0xff] }
  0xec   : > { %3601 = vmatpush3.bf16.msra.mxu0 %v3600_v21 }
  0xed   : > { %3602 = vmatprep.subr.bf16.mxu0 %v4141_v17 }
  0xf0   : > { %3604 = vmatpush3.bf16.msra.mxu0 %v3603_v24 }
  0xf1   : > { %3605 = vmatprep.subr.bf16.mxu0 %v4141_v17 }
  0xf4   : > { %3607 = vmatpush3.bf16.msra.mxu0 %v3606_v27  ;;  %v3826_v27 = vld [vmem:[#allocation7 + $0xc0] sm:$0xff]  }
  0xf5   : > { %3608 = vmatprep.subr.bf16.mxu0 %v4141_v17 }
  0xf8   : > { %3610 = vmatpush3.bf16.msra.mxu0 %v3609_v30  ;;  %v3829_v30 = vld [vmem:[#allocation7 + $0x48] sm:$0xff]  }
  0xf9   : > { %3611 = vmatprep.subr.bf16.mxu0 %v4141_v17  ;;  %3226 = vmatprep.subr.bf16.mxu1 %v3829_v30  ;;  %v1671_v30 = vld [vmem:[#allocation9 + $0x20] sm:$0xff] }
  0xfa   : > { %3227 = vmatpush3.bf16.msra.mxu1 %v3831_v32 }
  0xfb   : > { %3228 = vmatprep.subr.bf16.mxu1 %v3833_v34  ;;  %v1674_v34 = vld [vmem:[#allocation9 + $0x38] sm:$0xff] }
  0xfc   : > { %3613 = vmatpush3.bf16.msra.mxu0 %v3612_v33  ;;  %v3832_v33 = vld [vmem:[#allocation7 + $0x88] sm:$0xff]  }
  0xfd   : > { %3614 = vmatprep.subr.bf16.mxu0 %v4141_v17 }
  0xfe   : > { %3229 = vmatpush3.bf16.msra.mxu1 %v3835_v36  ;;  %v1675_v36 = vld [vmem:[#allocation9 + $0x40] sm:$0xff] }
  0xff   : > { %3230 = vmatprep.subr.bf16.mxu1 %v3837_v38 }
 0x100   : > { %3616 = vmatpush3.bf16.msra.mxu0 %v3615_v37  ;;  %v3836_v37 = vld [vmem:[#allocation7 + $0x90] sm:$0xff]  }
 0x101   : > { %3617 = vmatprep.subr.bf16.mxu0 %v4141_v17 }
 0x104   : > { %3619 = vmatpush3.bf16.msra.mxu0 %v3618_v39  ;;  %v3838_v39 = vld [vmem:[#allocation7 + $0xd8] sm:$0xff]  }
 0x105   : > { %3246 = vmatprep.subr.bf16.mxu0 %v3826_v27 }
 0x19a   : > { %v3148_v40 = vpop.f32.mrb[0].mxu0 }
 0x19b   : > { %v3149_v42 = vpop.f32.mrb[1].mxu0 }
 0x19c   : > { %v3150_v43 = vadd.f32 %v3149_v42, %v3148_v40  ;;  %v3151_v44 = vpop.f32.mrb[2].mxu0  ;;  %v3170_v45 = vpop.f32.mrb[0].mxu1  ;;  %v3839_v40 = vld [vmem:[#allocation7 + $0x18] sm:$0xff]   ;;  %v3841_v42 = vld [vmem:[#allocation7 + $0x60] sm:$0xff]  }
 0x19d   : > { %v3152_v46 = vpop.f32.mrb[3].mxu0  ;;  %v3171_v49 = vpop.f32.mrb[1].mxu1  ;;  %3231 = vmatpush3.bf16.msra.mxu1 %v3839_v40  ;;  %v1678_v40 = vld [vmem:[#allocation9 + $0x58] sm:$0xff] }
 0x19e   : > { %v1039_v47 = vadd.f32 %v3150_v43, %v2966_v41  ;;  %v3153_v48 = vadd.f32 %v3152_v46, %v3151_v44  ;;  %v3172_v50 = vadd.f32 %v3171_v49, %v3170_v45  ;;  %v3173_v51 = vpop.f32.mrb[2].mxu1  ;;  %v3842_v43 = vld [vmem:[#allocation7 + $0xe0] sm:$0xff]   ;;  %3232 = vmatprep.subr.bf16.mxu1 %v3841_v42  ;;  %v3845_v46 = vld [vmem:[#allocation7 + $0x68] sm:$0xff]  }
 0x19f   : > { %v3174_v53 = vpop.f32.mrb[3].mxu1  ;;  %v3843_v44 = vld [vmem:[#allocation7 + $0x20] sm:$0xff]   ;;  %v3848_v49 = vld [vmem:[#allocation7 + $0xa8] sm:$0xff]  }
 0x1a0   : > { %v1042_v52 = vadd.f32 %v3153_v48, %v2966_v41  ;;  %v1080_v54 = vadd.f32 %v3172_v50, %v1039_v47  ;;  %v3175_v55 = vadd.f32 %v3174_v53, %v3173_v51  ;;  %v3840_v41 = vld [vmem:[#allocation7 + $0x98] sm:$0xff]   ;;  %v3844_v45 = vld [vmem:[#allocation7 + $0xa0] sm:$0xff]   ;;  %v3846_v47 = vld [vmem:[#allocation7 + $0xe8] sm:$0xff]  }
 0x1a1   : > { %3233 = vmatpush3.bf16.msra.mxu1 %v3843_v44  ;;  %v3847_v48 = vld [vmem:[#allocation7 + $0x28] sm:$0xff]   ;;  %v3849_v50 = vld [vmem:[#allocation7 + $0x70] sm:$0xff]  }
 0x1a2   : > { %v1083_v56 = vadd.f32 %v3175_v55, %v1042_v52  ;;  %3234 = vmatprep.subr.bf16.mxu1 %v3845_v46  ;;  %v3850_v51 = vld [vmem:[#allocation7 + $0xf0] sm:$0xff]   ;;  %v3854_v55 = vld [vmem:[#allocation7 + $0xf8] sm:$0xff]  }
 0x1a3   : > { %v3851_v52 = vld [vmem:[#allocation7 + $0x30] sm:$0xff]   ;;  %v1682_v46 = vld [vmem:[#allocation9 + $0x78] sm:$0xff] }
 0x1a4   : > { %v3852_v53 = vld [vmem:[#allocation7 + $0xb0] sm:$0xff]  }
 0x1a5   : > { %3235 = vmatpush3.bf16.msra.mxu1 %v3847_v48 }
 0x1a6   : > { %3236 = vmatprep.subr.bf16.mxu1 %v3849_v50  ;;  %v3023_v50 = vld [vmem:[%s4854_s5] ss:$0 sm:$0xff] }
 0x1a9   : > { %3237 = vmatpush3.bf16.msra.mxu1 %v3851_v52 }
 0x1ba   : > { %v3192_v57 = vpop.f32.mrb[4].mxu0 }
 0x1bb   : > { %v3193_v58 = vpop.f32.mrb[5].mxu0 }
 0x1bc   : > { %v3194_v59 = vadd.f32 %v3193_v58, %v3192_v57  ;;  %v3195_v60 = vpop.f32.mrb[6].mxu0  ;;  %v1161_v61 = vpop.f32.mrb[4].mxu1  ;;  %v3856_v57 = vld [vmem:[#allocation7 + $0xb8] sm:$0xff]  }
 0x1bd   : > { %v3196_v62 = vpop.f32.mrb[7].mxu0  ;;  %v3434_v2 = vpop.f32.mrb[5].mxu1 }
 0x1be   : > { %v1121_v63 = vadd.f32 %v3194_v59, %v1080_v54  ;;  %v3197_v1 = vadd.f32 %v3196_v62, %v3195_v60  ;;  %v1164_v3 = vpop.f32.mrb[6].mxu1  ;;  %v3853_v54 = vld [vmem:[#allocation7 + $0x78] sm:$0xff]  }
 0x1bf   : > { %v3435_v6 = vpop.f32.mrb[7].mxu1  ;;  %3238 = vmatprep.subr.bf16.mxu1 %v3853_v54 }
 0x1c0   : > { %v4628_v4 = vadd.f32 %v1161_v61, %v1121_v63  ;;  %v1124_v5 = vadd.f32 %v3197_v1, %v1083_v56  ;;  %v3855_v56 = vld [vmem:[#allocation7 + $0x38] sm:$0xff]   ;;  %v1278_v63 = vlaneseq }
 0x1c1   : > { %3239 = vmatpush3.bf16.msra.mxu1 %v3855_v56 }
 0x1c2   : > { %v4630_v7 = vadd.f32 %v1164_v3, %v1124_v5  ;;  %v1175_v8 = vmul.f32 %v4628_v4, %v4628_v4  ;;  %3620 = vmatprep.subr.bf16.mxu1 %v4141_v17  ;;  %v1279_v3 = vshrl.u32 %v1278_v63, 7 }
 0x1c4   : > { %v1168_v9 = vadd.f32 %v4630_v7, %v4628_v4  ;;  %v1176_v10 = vmul.f32 %v4630_v7, %v4630_v7  ;;  %v4640_v5 = vsub.s32 0, %v1279_v3 }
 0x1c6   : > { %v1169_v11 = vrot.slane %v1168_v9, 4  ;;  %v1177_v12 = vadd.f32 %v1176_v10, %v1175_v8  ;;  %v4643_v8 = vsub.s32 1, %v1279_v3 }
 0x1c8   : > { %v1170_v13 = vadd.f32 %v1169_v11, %v1168_v9  ;;  %v1178_v14 = vrot.slane %v1177_v12, 4 }
 0x1ca   : > { %v1171_v15 = vrot.slane %v1170_v13, 2  ;;  %v1179_v16 = vadd.f32 %v1178_v14, %v1177_v12 }
 0x1cc   : > { %v1172_v18 = vadd.f32 %v1171_v15, %v1170_v13  ;;  %v1180_v19 = vrot.slane %v1179_v16, 2 }
 0x1ce   : > { %v1173_v20 = vrot.slane %v1172_v18, 1  ;;  %v1181_v21 = vadd.f32 %v1180_v19, %v1179_v16  ;;  %v1668_v19 = vld [vmem:[#allocation9 + $0x8] sm:$0xff] }
 0x1d0   : > { %v1182_v22 = vrot.slane %v1181_v21, 1  ;;  %v1174_v23 = vadd.f32 %v1173_v20, %v1172_v18  ;;  %v1667_v18 = vld [vmem:[#allocation9] sm:$0xff] }
 0x1d2   : > { %v1183_v24 = vadd.f32 %v1182_v22, %v1181_v21 }
 0x1d4   : > { %v1185_v25 = vsel %vm1184_vm1, %v1174_v23, %v1183_v24 }
 0x1d5   : > { %3469 = vmatmul.mubr.f32.vlgmr.msra.gmra.mrb[8].mxu0 %v1185_v25 }
 0x1d6   : > { %3247 = vmatpush3.bf16.msra.mxu0 %v3828_v29 }
 0x1d7   : > { %3248 = vmatprep.subr.bf16.mxu0 %v3830_v31  ;;  %v1672_v31 = vld [vmem:[#allocation9 + $0x28] sm:$0xff] }
 0x1d8   : > { %v3627_v32 = vpack.c.bf16 %v1672_v31, %v1671_v30  ;;  %v3872_v30 = vld [vmem:[#allocation10 + $0x98] sm:$0xff]   ;;  %v3873_v31 = vld [vmem:[#allocation10 + $0x60] sm:$0xff]  }
 0x1da   : > { %3249 = vmatpush3.bf16.msra.mxu0 %v3832_v33  ;;  %v1673_v33 = vld [vmem:[#allocation9 + $0x30] sm:$0xff] }
 0x1db   : > { %3250 = vmatprep.subr.bf16.mxu0 %v3834_v35  ;;  %v3630_v35 = vpack.c.bf16 %v1674_v34, %v1673_v33  ;;  %v3875_v33 = vld [vmem:[#allocation10 + $0x20] sm:$0xff]  }
 0x1dc   : > { %v3876_v34 = vld [vmem:[#allocation10 + $0xa0] sm:$0xff]  }
 0x1de   : > { %3251 = vmatpush3.bf16.msra.mxu0 %v3836_v37  ;;  %v1676_v37 = vld [vmem:[#allocation9 + $0x48] sm:$0xff] }
 0x1df   : > { %3252 = vmatprep.subr.bf16.mxu0 %v3838_v39  ;;  %v3633_v38 = vpack.c.bf16 %v1676_v37, %v1675_v36  ;;  %v1677_v39 = vld [vmem:[#allocation9 + $0x50] sm:$0xff]  ;;  %v3878_v36 = vld [vmem:[#allocation10 + $0xe8] sm:$0xff]  }
 0x1e0   : > { %v3636_v42 = vpack.c.bf16 %v1678_v40, %v1677_v39  ;;  %v3879_v37 = vld [vmem:[#allocation10 + $0x28] sm:$0xff]   ;;  %v3881_v39 = vld [vmem:[#allocation10 + $0x70] sm:$0xff]  }
 0x1e1   : > { %v3882_v40 = vld [vmem:[#allocation10 + $0xf0] sm:$0xff]  }
 0x1e2   : > { %3253 = vmatpush3.bf16.msra.mxu0 %v3840_v41  ;;  %v1679_v41 = vld [vmem:[#allocation9 + $0x60] sm:$0xff] }
 0x1e3   : > { %3254 = vmatprep.subr.bf16.mxu0 %v3842_v43  ;;  %v1680_v43 = vld [vmem:[#allocation9 + $0x68] sm:$0xff] }
 0x1e4   : > { %v3639_v44 = vpack.c.bf16 %v1680_v43, %v1679_v41  ;;  %v3883_v41 = vld [vmem:[#allocation10 + $0x30] sm:$0xff]   ;;  %v3885_v43 = vld [vmem:[#allocation10 + $0x78] sm:$0xff]  }
 0x1e6   : > { %3255 = vmatpush3.bf16.msra.mxu0 %v3844_v45  ;;  %v1681_v45 = vld [vmem:[#allocation9 + $0x70] sm:$0xff] }
 0x1e7   : > { %3256 = vmatprep.subr.bf16.mxu0 %v3846_v47  ;;  %v3642_v47 = vpack.c.bf16 %v1682_v46, %v1681_v45  ;;  %v3887_v45 = vld [vmem:[#allocation10 + $0x38] sm:$0xff]  }
 0x1e8   : > { %v3888_v46 = vld [vmem:[#allocation10 + $0xb8] sm:$0xff]  }
 0x1ea   : > { %3257 = vmatpush3.bf16.msra.mxu0 %v3848_v49 }
 0x1eb   : > { %3258 = vmatprep.subr.bf16.mxu0 %v3850_v51 }
 0x1ee   : > { %3259 = vmatpush3.bf16.msra.mxu0 %v3852_v53 }
 0x1ef   : > { %3260 = vmatprep.subr.bf16.mxu0 %v3854_v55 }
 0x1f2   : > { %3261 = vmatpush3.bf16.msra.mxu0 %v3856_v57 }
 0x2a8   : > { %v1268_v58 = vpop.f32.mrb[8].mxu0 }
 0x2a9   : > { %v1272_v59 = vmul.f32 0.00390625, %v1268_v58  ;;  %v3470_v60 = vpop.f32.mrb[9].mxu0 }
 0x2ab   : > { %v1273_v61 = vmul.f32 %v1272_v59, %v1272_v59  ;;  %v1281_v6 = vrot.slane %v1272_v59, %v4640_v5 }
 0x2ad   : > { %v1275_v62 = vrot.slane %v1273_v61, 7  ;;  %v1282_v10 = vsub.f32 %v4628_v4, %v1281_v6  ;;  %v1283_v11 = vsub.f32 %v4630_v7, %v1281_v6  ;;  %v3621_v4 = vpack.c.bf16 %v1668_v19, %v1667_v18  ;;  %v1669_v7 = vld [vmem:[#allocation9 + $0x10] sm:$0xff]  ;;  %v3858_v18 = vld [vmem:[#allocation10 + $0xc0] sm:$0xff]  }
 0x2ae   : > { %v3624_v29 = vpack.c.bf16 %v1670_v28, %v1669_v7  ;;  %v3859_v19 = vld [vmem:[#allocation10] sm:$0xff]   ;;  %v3869_v7 = vld [vmem:[#allocation10 + $0x58] sm:$0xff]  }
 0x2af   : > { %v1277_v1 = vsub.f32 %v1272_v59, %v1275_v62  ;;  %v3870_v28 = vld [vmem:[#allocation10 + $0xd8] sm:$0xff]  }
 0x2b1   : > { %v1284_v2 = vadd.f32 1e-05, %v1277_v1 }
 0x2b3   : > { %3929 = vrsqrt.f32 %v1284_v2 }
 0x2bd   : > { %v3930_v9 = vpop.eup %3929 }
 0x2be   : > { %v1289_v12 = vrot.slane %v3930_v9, %v4643_v8 }
 0x2c0   : > { %v1290_v13 = vmul.f32 %v1289_v12, %v1282_v10  ;;  %v1291_v14 = vmul.f32 %v1289_v12, %v1283_v11 }
 0x2c2   : > { %v1292_v15 = vmax.f32 %v1290_v13, 0.0  ;;  %v1293_v16 = vmax.f32 %v1291_v14, 0.0 }
 0x2c4   : > { %1296 = vst [vmem:[#allocation2 + $0x8] sm:$0xff] %v1292_v15  ;;  %1297 = vst [vmem:[#allocation2 + $0x10] sm:$0xff] %v1293_v16  ;;  %v3857_v16 = vld [vmem:[#allocation10 + $0x40] sm:$0xff]  }
 0x2c5   : > { %3285 = vmatprep.subr.bf16.mxu0 %v3857_v16  ;;  %v2152_v16 = vld [vmem:[#allocation12 + $0x28] sm:$0xff] }
 0x2cb   : > { %v1302_v20 = vld [vmem:[#allocation2 + $0x8] ss:$2 sm:$0xff]  ;;  %v1299_v22 = vld [vmem:[#allocation2 + $0x7] ss:$2 sm:$0xff] }
 0x2cc   : > { %v1308_v21 = vld [vmem:[#allocation2 + $0xa] ss:$2 sm:$0xff]  ;;  %v1303_v23 = vpack.c.bf16 %v1302_v20, %v1302_v20  ;;  %v1300_v25 = vpack.c.bf16 %v1299_v22, %v1299_v22  ;;  %v1305_v26 = vld [vmem:[#allocation2 + $0x9] ss:$2 sm:$0xff] }
 0x2cd   : > { %v1309_v24 = vpack.c.bf16 %v1308_v21, %v1308_v21  ;;  %v1306_v27 = vpack.c.bf16 %v1305_v26, %v1305_v26  ;;  %v3860_v20 = vld [vmem:[#allocation10 + $0x80] sm:$0xff]   ;;  %v3861_v21 = vld [vmem:[#allocation10 + $0x48] sm:$0xff]   ;;  %v3866_v26 = vld [vmem:[#allocation10 + $0xd0] sm:$0xff]  }
 0x2ce   : > { %1605 = vmatprep.mubr.bf16.mxu1 %v1303_v23  ;;  %v3862_v22 = vld [vmem:[#allocation10 + $0xc8] sm:$0xff]  }
 0x2cf   : > { %1645 = vmatprep.mubr.bf16.mxu0 %v1309_v24  ;;  %1606 = vmatmul.mubr.bf16.vlgmr.msra.gmra.mrb[8].mxu1 %v1300_v25  ;;  %v3863_v23 = vld [vmem:[#allocation10 + $0x8] sm:$0xff]   ;;  %v3865_v25 = vld [vmem:[#allocation10 + $0x50] sm:$0xff]  }
 0x2d0   : > { %1646 = vmatmul.mubr.bf16.vlgmr.msra.gmra.mrb[12].mxu0 %v1306_v27  ;;  %3622 = vmatpush3.bf16.msra.mxu1 %v3621_v4  ;;  %v3864_v24 = vld [vmem:[#allocation10 + $0x88] sm:$0xff]   ;;  %v3867_v4 = vld [vmem:[#allocation10 + $0x10] sm:$0xff]  }
 0x2d1   : > { %3503 = vmatprep.mubr.msk.f32.mxu1 %vm4140_vm0, %v4139_v0  ;;  %3623 = vmatprep.subr.bf16.mxu1 %v4141_v17  ;;  %v3868_v27 = vld [vmem:[#allocation10 + $0x90] sm:$0xff]  }
 0x2d2   : > { %3286 = vmatpush3.bf16.msra.mxu0 %v3859_v19  ;;  %v2153_v19 = vld [vmem:[#allocation12 + $0x30] sm:$0xff] }
 0x2d3   : > { %3287 = vmatprep.subr.bf16.mxu0 %v3861_v21 }
 0x2d4   : > { %3625 = vmatpush3.bf16.msra.mxu1 %v3624_v29  ;;  %v3871_v29 = vld [vmem:[#allocation10 + $0x18] sm:$0xff]  }
 0x2d5   : > { %3626 = vmatprep.subr.bf16.mxu1 %v4141_v17 }
 0x2d6   : > { %3288 = vmatpush3.bf16.msra.mxu0 %v3863_v23  ;;  %v2156_v23 = vld [vmem:[#allocation12 + $0x48] sm:$0xff] }
 0x2d7   : > { %3289 = vmatprep.subr.bf16.mxu0 %v3865_v25  ;;  %v2157_v25 = vld [vmem:[#allocation12 + $0x50] sm:$0xff] }
 0x2d8   : > { %3628 = vmatpush3.bf16.msra.mxu1 %v3627_v32  ;;  %v3874_v32 = vld [vmem:[#allocation10 + $0xe0] sm:$0xff]  }
 0x2d9   : > { %3629 = vmatprep.subr.bf16.mxu1 %v4141_v17 }
 0x2da   : > { %3290 = vmatpush3.bf16.msra.mxu0 %v3867_v4 }
 0x2db   : > { %3291 = vmatprep.subr.bf16.mxu0 %v3869_v7  ;;  %v2160_v7 = vld [vmem:[#allocation12 + $0x68] sm:$0xff] }
 0x2dc   : > { %3631 = vmatpush3.bf16.msra.mxu1 %v3630_v35  ;;  %v3877_v35 = vld [vmem:[#allocation10 + $0x68] sm:$0xff]  }
 0x2dd   : > { %3632 = vmatprep.subr.bf16.mxu1 %v4141_v17 }
 0x2de   : > { %3292 = vmatpush3.bf16.msra.mxu0 %v3871_v29  ;;  %v2161_v29 = vld [vmem:[#allocation12 + $0x70] sm:$0xff] }
 0x2df   : > { %3293 = vmatprep.subr.bf16.mxu0 %v3873_v31 }
 0x2e0   : > { %3634 = vmatpush3.bf16.msra.mxu1 %v3633_v38  ;;  %v3880_v38 = vld [vmem:[#allocation10 + $0xa8] sm:$0xff]  }
 0x2e1   : > { %3635 = vmatprep.subr.bf16.mxu1 %v4141_v17 }
 0x2e2   : > { %3294 = vmatpush3.bf16.msra.mxu0 %v3875_v33 }
 0x2e3   : > { %3295 = vmatprep.subr.bf16.mxu0 %v3877_v35 }
 0x2e4   : > { %3637 = vmatpush3.bf16.msra.mxu1 %v3636_v42  ;;  %v3884_v42 = vld [vmem:[#allocation10 + $0xb0] sm:$0xff]  }
 0x2e5   : > { %3638 = vmatprep.subr.bf16.mxu1 %v4141_v17 }
 0x2e6   : > { %3296 = vmatpush3.bf16.msra.mxu0 %v3879_v37 }
 0x2e7   : > { %3297 = vmatprep.subr.bf16.mxu0 %v3881_v39 }
 0x2e8   : > { %3640 = vmatpush3.bf16.msra.mxu1 %v3639_v44  ;;  %v3886_v44 = vld [vmem:[#allocation10 + $0xf8] sm:$0xff]  }
 0x2e9   : > { %3641 = vmatprep.subr.bf16.mxu1 %v4141_v17 }
 0x2ea   : > { %3298 = vmatpush3.bf16.msra.mxu0 %v3883_v41 }
 0x2eb   : > { %3299 = vmatprep.subr.bf16.mxu0 %v3885_v43 }
 0x2ec   : > { %3643 = vmatpush3.bf16.msra.mxu1 %v3642_v47 }
 0x2ed   : > { %3307 = vmatprep.subr.bf16.mxu1 %v3858_v18 }
 0x2ee   : > { %3300 = vmatpush3.bf16.msra.mxu0 %v3887_v45 }
 0x2ef   : > { %3644 = vmatprep.subr.bf16.mxu0 %v4141_v17 }
 0x3a2   : > { %v3240_v48 = vpop.f32.mrb[8].mxu1 }
 0x3a3   : > { %v3262_v49 = vpop.f32.mrb[12].mxu0  ;;  %v3241_v51 = vpop.f32.mrb[9].mxu1 }
 0x3a4   : > { %v3263_v52 = vpop.f32.mrb[13].mxu0  ;;  %v3242_v53 = vadd.f32 %v3241_v51, %v3240_v48  ;;  %v3243_v55 = vpop.f32.mrb[10].mxu1 }
 0x3a5   : > { %v3264_v54 = vadd.f32 %v3263_v52, %v3262_v49  ;;  %v3265_v56 = vpop.f32.mrb[14].mxu0  ;;  %v3244_v57 = vpop.f32.mrb[11].mxu1 }
 0x3a6   : > { %v3266_v58 = vpop.f32.mrb[15].mxu0  ;;  %v1608_v59 = vadd.f32 %v3242_v53, %v3023_v50 }
 0x3a8   : > { %v4660_v60 = vadd.f32 %v3264_v54, %v1608_v59 }
 0x3aa   : > { %v1653_v61 = vrot.slane %v4660_v60, 4  ;;  %v1659_v62 = vmul.f32 %v4660_v60, %v4660_v60 }
 0x3ac   : > { %v1654_v63 = vadd.f32 %v1653_v61, %v4660_v60  ;;  %v1660_v1 = vrot.slane %v1659_v62, 4  ;;  %v2147_v61 = vld [vmem:[#allocation12] sm:$0xff] }
 0x3ae   : > { %v1655_v2 = vrot.slane %v1654_v63, 2  ;;  %v1661_v3 = vadd.f32 %v1660_v1, %v1659_v62  ;;  %v2148_v62 = vld [vmem:[#allocation12 + $0x8] sm:$0xff] }
 0x3b0   : > { %v1656_v6 = vadd.f32 %v1655_v2, %v1654_v63  ;;  %v1662_v9 = vrot.slane %v1661_v3, 2 }
 0x3b2   : > { %v1657_v10 = vrot.slane %v1656_v6, 1  ;;  %v1663_v11 = vadd.f32 %v1662_v9, %v1661_v3 }
 0x3b4   : > { %v1664_v12 = vrot.slane %v1663_v11, 1  ;;  %v1658_v13 = vadd.f32 %v1657_v10, %v1656_v6  ;;  %v3645_v10 = vpack.c.bf16 %v2148_v62, %v2147_v61  ;;  %v3889_v62 = vld [vmem:[%s4859_s10 + $0x40] sm:$0xff]  }
 0x3b6   : > { %v1665_v14 = vadd.f32 %v1664_v12, %v1663_v11 }
 0x3b8   : > { %v1666_v15 = vsel %vm1184_vm1, %v1658_v13, %v1665_v14  ;;  %v2149_v13 = vld [vmem:[#allocation12 + $0x10] sm:$0xff]  ;;  %v2150_v14 = vld [vmem:[#allocation12 + $0x18] sm:$0xff] }
 0x3b9   : > { %3504 = vmatmul.mubr.f32.vlgmr.msra.gmra.mrb[12].mxu1 %v1666_v15  ;;  %v2151_v15 = vld [vmem:[#allocation12 + $0x20] sm:$0xff] }
 0x3ba   : > { %3308 = vmatpush3.bf16.msra.mxu1 %v3860_v20  ;;  %v3651_v18 = vpack.c.bf16 %v2152_v16, %v2151_v15  ;;  %v2154_v20 = vld [vmem:[#allocation12 + $0x38] sm:$0xff]  ;;  %v3902_v15 = vld [vmem:[%s4859_s10 + $0x18] sm:$0xff]  }
 0x3bb   : > { %3309 = vmatprep.subr.bf16.mxu1 %v3862_v22  ;;  %v3654_v21 = vpack.c.bf16 %v2154_v20, %v2153_v19  ;;  %v2155_v22 = vld [vmem:[#allocation12 + $0x40] sm:$0xff]  ;;  %v3903_v16 = vld [vmem:[%s4859_s10 + $0xd8] sm:$0xff]   ;;  %v3905_v19 = vld [vmem:[%s4859_s10 + $0x60] sm:$0xff]  }
 0x3bc   : > { %v3906_v20 = vld [vmem:[%s4859_s10 + $0x20] sm:$0xff]  }
 0x3be   : > { %3310 = vmatpush3.bf16.msra.mxu1 %v3864_v24  ;;  %v3657_v24 = vpack.c.bf16 %v2156_v23, %v2155_v22  ;;  %v3908_v22 = vld [vmem:[%s4859_s10 + $0xa0] sm:$0xff]   ;;  %v3909_v23 = vld [vmem:[%s4859_s10 + $0x68] sm:$0xff]  }
 0x3bf   : > { %3311 = vmatprep.subr.bf16.mxu1 %v3866_v26  ;;  %v2158_v26 = vld [vmem:[#allocation12 + $0x58] sm:$0xff] }
 0x3c0   : > { %v3660_v4 = vpack.c.bf16 %v2158_v26, %v2157_v25  ;;  %v3911_v25 = vld [vmem:[%s4859_s10 + $0xe8] sm:$0xff]  }
 0x3c1   : > { %v3912_v26 = vld [vmem:[%s4859_s10 + $0xa8] sm:$0xff]  }
 0x3c2   : > { %3312 = vmatpush3.bf16.msra.mxu1 %v3868_v27  ;;  %v2159_v27 = vld [vmem:[#allocation12 + $0x60] sm:$0xff] }
 0x3c3   : > { %3313 = vmatprep.subr.bf16.mxu1 %v3870_v28  ;;  %v3663_v28 = vpack.c.bf16 %v2160_v7, %v2159_v27  ;;  %v3914_v27 = vld [vmem:[%s4859_s10 + $0x30] sm:$0xff]  }
 0x3c4   : > { %v3915_v7 = vld [vmem:[%s4859_s10 + $0xf0] sm:$0xff]  }
 0x3c6   : > { %3314 = vmatpush3.bf16.msra.mxu1 %v3872_v30  ;;  %v2162_v30 = vld [vmem:[#allocation12 + $0x78] sm:$0xff] }
 0x3c7   : > { %3315 = vmatprep.subr.bf16.mxu1 %v3874_v32  ;;  %v3666_v31 = vpack.c.bf16 %v2162_v30, %v2161_v29  ;;  %v3917_v29 = vld [vmem:[%s4859_s10 + $0x78] sm:$0xff]  }
 0x3c8   : > { %v3919_v30 = vld [vmem:[%s4859_s10 + $0xf8] sm:$0xff]  }
 0x3ca   : > { %3316 = vmatpush3.bf16.msra.mxu1 %v3876_v34  ;;  %v3056_v34 = vld [vmem:[%s4857_s8] ss:$0 sm:$0xff] }
 0x3cb   : > { %3317 = vmatprep.subr.bf16.mxu1 %v3878_v36 }
 0x3ce   : > { %3318 = vmatpush3.bf16.msra.mxu1 %v3880_v38 }
 0x3cf   : > { %3319 = vmatprep.subr.bf16.mxu1 %v3882_v40 }
 0x3d2   : > { %3320 = vmatpush3.bf16.msra.mxu1 %v3884_v42 }
 0x3d3   : > { %3321 = vmatprep.subr.bf16.mxu1 %v3886_v44 }
 0x3d6   : > { %3322 = vmatpush3.bf16.msra.mxu1 %v3888_v46 }
 0x3d7   : > { %3346 = vmatprep.subr.bf16.mxu1 %v3889_v62  ;;  %v3928_v62 = vld [vmem:[%s4859_s10 + $0x138] sm:$0xff]  }
 0x48c   : > { %v1749_v47 = vpop.f32.mrb[12].mxu1 }
 0x48d   : > { %v1753_v48 = vmul.f32 0.015625, %v1749_v47  ;;  %v3505_v49 = vpop.f32.mrb[13].mxu1 }
 0x48f   : > { %v1754_v50 = vmul.f32 %v1753_v48, %v1753_v48  ;;  %v1762_v54 = vrot.slane %v1753_v48, %v4640_v5 }
 0x491   : > { %v1756_v51 = vrot.slane %v1754_v50, 7  ;;  %v1763_v56 = vsub.f32 %v4660_v60, %v1762_v54  ;;  %v3648_v60 = vpack.c.bf16 %v2150_v14, %v2149_v13  ;;  %v3899_v13 = vld [vmem:[%s4859_s10 + $0xd0] sm:$0xff]  }
 0x492   : > { %v3900_v14 = vld [vmem:[%s4859_s10 + $0x90] sm:$0xff]  }
 0x493   : > { %v1758_v52 = vsub.f32 %v1753_v48, %v1756_v51 }
 0x495   : > { %v1764_v53 = vadd.f32 1e-05, %v1758_v52 }
 0x497   : > { %3931 = vrsqrt.f32 %v1764_v53 }
 0x4a1   : > { %v3932_v55 = vpop.eup %3931 }
 0x4a2   : > { %v1769_v57 = vrot.slane %v3932_v55, %v4643_v8 }
 0x4a4   : > { %v1770_v58 = vmul.f32 %v1769_v57, %v1763_v56 }
 0x4a6   : > { %v1771_v59 = vmax.f32 %v1770_v58, 0.0 }
 0x4a8   : > { %1774 = vst [vmem:[#allocation3 + $0x8] sm:$0xff] %v1771_v59 }
 0x4af   : > { %v1779_v63 = vld [vmem:[#allocation3 + $0x8] ss:$2 sm:$0xf]  ;;  %v1776_v6 = vld [vmem:[#allocation3 + $0x7] ss:$2 sm:$0xf] }
 0x4b0   : > { %v1785_v1 = vld [vmem:[#allocation3 + $0xa] ss:$2 sm:$0xf]  ;;  %v1780_v2 = vpack.c.bf16 %v1779_v63, %v1779_v63  ;;  %v1782_v9 = vld [vmem:[#allocation3 + $0x9] ss:$2 sm:$0xf]  ;;  %v1777_v11 = vpack.c.bf16 %v1776_v6, %v1776_v6 }
 0x4b1   : > { %v1786_v3 = vpack.c.bf16 %v1785_v1, %v1785_v1  ;;  %v1783_v12 = vpack.c.bf16 %v1782_v9, %v1782_v9  ;;  %v3890_v63 = vld [vmem:[%s4859_s10] sm:$0xff]   ;;  %v3894_v6 = vld [vmem:[%s4859_s10 + $0x8] sm:$0xff]  }
 0x4b2   : > { %2082 = vmatprep.mubr.bf16.mxu0 %v1780_v2  ;;  %v3891_v1 = vld [vmem:[%s4859_s10 + $0xc0] sm:$0xff]   ;;  %v3895_v9 = vld [vmem:[%s4859_s10 + $0xc8] sm:$0xff]  }
 0x4b3   : > { %2122 = vmatprep.mubr.bf16.mxu1 %v1786_v3  ;;  %2083 = vmatmul.mubr.bf16.vlgmr.msra.gmra.mrb[16].mxu0 %v1777_v11  ;;  %v3892_v2 = vld [vmem:[%s4859_s10 + $0x80] sm:$0xff]   ;;  %v3893_v3 = vld [vmem:[%s4859_s10 + $0x48] sm:$0xff]   ;;  %v3897_v11 = vld [vmem:[%s4859_s10 + $0x50] sm:$0xff]  }
 0x4b4   : > { %2123 = vmatmul.mubr.bf16.vlgmr.msra.gmra.mrb[16].mxu1 %v1783_v12  ;;  %3646 = vmatpush3.bf16.msra.mxu0 %v3645_v10  ;;  %v3896_v10 = vld [vmem:[%s4859_s10 + $0x88] sm:$0xff]   ;;  %v3898_v12 = vld [vmem:[%s4859_s10 + $0x10] sm:$0xff]  }
 0x4b5   : > { %3538 = vmatprep.mubr.msk.f32.mxu0 %vm4140_vm0, %v4139_v0  ;;  %3647 = vmatprep.subr.bf16.mxu0 %v4141_v17 }
 0x4b6   : > { %3347 = vmatpush3.bf16.msra.mxu1 %v3890_v63 }
 0x4b7   : > { %3348 = vmatprep.subr.bf16.mxu1 %v3893_v3  ;;  %v2729_v3 = vld [vmem:[#allocation13 + $0x8] sm:$0xff] }
 0x4b8   : > { %3649 = vmatpush3.bf16.msra.mxu0 %v3648_v60  ;;  %v3901_v60 = vld [vmem:[%s4859_s10 + $0x58] sm:$0xff]  }
 0x4b9   : > { %3650 = vmatprep.subr.bf16.mxu0 %v4141_v17 }
 0x4ba   : > { %3349 = vmatpush3.bf16.msra.mxu1 %v3894_v6  ;;  %v2730_v6 = vld [vmem:[#allocation13 + $0x10] sm:$0xff] }
 0x4bb   : > { %3350 = vmatprep.subr.bf16.mxu1 %v3897_v11 }
 0x4bc   : > { %3652 = vmatpush3.bf16.msra.mxu0 %v3651_v18  ;;  %v3904_v18 = vld [vmem:[%s4859_s10 + $0x98] sm:$0xff]  }
 0x4bd   : > { %3653 = vmatprep.subr.bf16.mxu0 %v4141_v17 }
 0x4be   : > { %3351 = vmatpush3.bf16.msra.mxu1 %v3898_v12  ;;  %v2732_v12 = vld [vmem:[#allocation13 + $0x20] sm:$0xff] }
 0x4bf   : > { %3352 = vmatprep.subr.bf16.mxu1 %v3901_v60  ;;  %v2735_v60 = vld [vmem:[#allocation13 + $0x38] sm:$0xff] }
 0x4c0   : > { %3655 = vmatpush3.bf16.msra.mxu0 %v3654_v21  ;;  %v3907_v21 = vld [vmem:[%s4859_s10 + $0xe0] sm:$0xff]  }
 0x4c1   : > { %3656 = vmatprep.subr.bf16.mxu0 %v4141_v17 }
 0x4c2   : > { %3353 = vmatpush3.bf16.msra.mxu1 %v3902_v15 }
 0x4c3   : > { %3354 = vmatprep.subr.bf16.mxu1 %v3905_v19 }
 0x4c4   : > { %3658 = vmatpush3.bf16.msra.mxu0 %v3657_v24  ;;  %v3910_v24 = vld [vmem:[%s4859_s10 + $0x28] sm:$0xff]  }
 0x4c5   : > { %3659 = vmatprep.subr.bf16.mxu0 %v4141_v17 }
 0x4c6   : > { %3355 = vmatpush3.bf16.msra.mxu1 %v3906_v20  ;;  %v2738_v20 = vld [vmem:[#allocation13 + $0x50] sm:$0xff] }
 0x4c7   : > { %3356 = vmatprep.subr.bf16.mxu1 %v3909_v23  ;;  %v2740_v23 = vld [vmem:[#allocation13 + $0x60] sm:$0xff] }
 0x4c8   : > { %3661 = vmatpush3.bf16.msra.mxu0 %v3660_v4  ;;  %v3913_v4 = vld [vmem:[%s4859_s10 + $0x70] sm:$0xff]  }
 0x4c9   : > { %3662 = vmatprep.subr.bf16.mxu0 %v4141_v17 }
 0x4ca   : > { %3357 = vmatpush3.bf16.msra.mxu1 %v3910_v24  ;;  %v2741_v24 = vld [vmem:[#allocation13 + $0x68] sm:$0xff] }
 0x4cb   : > { %3358 = vmatprep.subr.bf16.mxu1 %v3913_v4  ;;  %v2743_v4 = vld [vmem:[#allocation13 + $0x78] sm:$0xff] }
 0x4cc   : > { %3664 = vmatpush3.bf16.msra.mxu0 %v3663_v28  ;;  %v3916_v28 = vld [vmem:[%s4859_s10 + $0xb0] sm:$0xff]  }
 0x4cd   : > { %3665 = vmatprep.subr.bf16.mxu0 %v4141_v17 }
 0x4ce   : > { %3359 = vmatpush3.bf16.msra.mxu1 %v3914_v27 }
 0x4cf   : > { %3360 = vmatprep.subr.bf16.mxu1 %v3917_v29  ;;  %v3089_v29 = vld [vmem:[%s4860_s11] ss:$0 sm:$0xff] }
 0x4d0   : > { %3667 = vmatpush3.bf16.msra.mxu0 %v3666_v31  ;;  %v3918_v31 = vld [vmem:[%s4859_s10 + $0x38] sm:$0xff]  }
 0x4d1   : > { %3368 = vmatprep.subr.bf16.mxu0 %v3891_v1 }
 0x4d2   : > { %3361 = vmatpush3.bf16.msra.mxu1 %v3918_v31 }
 0x4d3   : > { %3541 = vmatprep.subr.bf16.mxu1 %v4139_v0 }
 0x586   : > { %v3301_v32 = vpop.f32.mrb[16].mxu0 }
 0x587   : > { %v3323_v33 = vpop.f32.mrb[16].mxu1  ;;  %v3302_v35 = vpop.f32.mrb[17].mxu0 }
 0x588   : > { %v3324_v36 = vpop.f32.mrb[17].mxu1  ;;  %v3303_v37 = vadd.f32 %v3302_v35, %v3301_v32  ;;  %v3304_v39 = vpop.f32.mrb[18].mxu0  ;;  %v3920_v32 = vld [vmem:[%s4859_s10 + $0xb8] sm:$0xff]  }
 0x589   : > { %v3325_v38 = vadd.f32 %v3324_v36, %v3323_v33  ;;  %v3326_v40 = vpop.f32.mrb[18].mxu1  ;;  %v3305_v41 = vpop.f32.mrb[19].mxu0 }
 0x58a   : > { %v3327_v42 = vpop.f32.mrb[19].mxu1  ;;  %v2085_v43 = vadd.f32 %v3303_v37, %v3056_v34 }
 0x58c   : > { %v4683_v44 = vadd.f32 %v3325_v38, %v2085_v43 }
 0x58e   : > { %v2131_v45 = vsel %vm2130_vm2, %v4683_v44, 0.0  ;;  %v2138_v46 = vmul.f32 %v4683_v44, %v4683_v44 }
 0x58f   : > { %v2132_v47 = vrot.slane %v2131_v45, 4 }
 0x590   : > { %v2139_v48 = vsel %vm2130_vm2, %v2138_v46, 0.0 }
 0x591   : > { %v2133_v49 = vadd.f32 %v2132_v47, %v2131_v45  ;;  %v2140_v50 = vrot.slane %v2139_v48, 4 }
 0x593   : > { %v2134_v51 = vrot.slane %v2133_v49, 2  ;;  %v2141_v52 = vadd.f32 %v2140_v50, %v2139_v48 }
 0x595   : > { %v2135_v53 = vadd.f32 %v2134_v51, %v2133_v49  ;;  %v2142_v54 = vrot.slane %v2141_v52, 2 }
 0x597   : > { %v2136_v55 = vrot.slane %v2135_v53, 1  ;;  %v2143_v56 = vadd.f32 %v2142_v54, %v2141_v52  ;;  %v3921_v54 = vld [vmem:[%s4859_s10 + $0x100] sm:$0xff]  }
 0x599   : > { %v2144_v57 = vrot.slane %v2143_v56, 1  ;;  %v2137_v58 = vadd.f32 %v2136_v55, %v2135_v53 }
 0x59b   : > { %v2145_v59 = vadd.f32 %v2144_v57, %v2143_v56  ;;  %v3923_v56 = vld [vmem:[%s4859_s10 + $0x110] sm:$0xff]   ;;  %v3924_v57 = vld [vmem:[%s4859_s10 + $0x118] sm:$0xff]  }
 0x59d   : > { %v2146_v61 = vsel %vm1184_vm1, %v2137_v58, %v2145_v59  ;;  %v3925_v58 = vld [vmem:[%s4859_s10 + $0x120] sm:$0xff]   ;;  %v3926_v59 = vld [vmem:[%s4859_s10 + $0x128] sm:$0xff]  }
 0x59e   : > { %3539 = vmatmul.mubr.f32.vlgmr.msra.gmra.mrb[10].mxu0 %v2146_v61  ;;  %v3927_v61 = vld [vmem:[%s4859_s10 + $0x130] sm:$0xff]  }
 0x59f   : > { %3369 = vmatpush3.bf16.msra.mxu0 %v3892_v2  ;;  %v2728_v2 = vld [vmem:[#allocation13] sm:$0xff] }
 0x5a0   : > { %3370 = vmatprep.subr.bf16.mxu0 %v3895_v9  ;;  %v3669_v9 = vpack.c.bf16 %v2729_v3, %v2728_v2 }
 0x5a3   : > { %3371 = vmatpush3.bf16.msra.mxu0 %v3896_v10  ;;  %v2731_v10 = vld [vmem:[#allocation13 + $0x18] sm:$0xff] }
 0x5a4   : > { %3372 = vmatprep.subr.bf16.mxu0 %v3899_v13  ;;  %v3672_v11 = vpack.c.bf16 %v2731_v10, %v2730_v6  ;;  %v2733_v13 = vld [vmem:[#allocation13 + $0x28] sm:$0xff] }
 0x5a7   : > { %3373 = vmatpush3.bf16.msra.mxu0 %v3900_v14  ;;  %v3675_v14 = vpack.c.bf16 %v2733_v13, %v2732_v12 }
 0x5a8   : > { %3374 = vmatprep.subr.bf16.mxu0 %v3903_v16  ;;  %v2736_v16 = vld [vmem:[#allocation13 + $0x40] sm:$0xff] }
 0x5ab   : > { %3375 = vmatpush3.bf16.msra.mxu0 %v3904_v18  ;;  %v2737_v18 = vld [vmem:[#allocation13 + $0x48] sm:$0xff] }
 0x5ac   : > { %3376 = vmatprep.subr.bf16.mxu0 %v3907_v21  ;;  %v3681_v19 = vpack.c.bf16 %v2737_v18, %v2736_v16  ;;  %v2739_v21 = vld [vmem:[#allocation13 + $0x58] sm:$0xff] }
 0x5af   : > { %3377 = vmatpush3.bf16.msra.mxu0 %v3908_v22  ;;  %v3684_v22 = vpack.c.bf16 %v2739_v21, %v2738_v20 }
 0x5b0   : > { %3378 = vmatprep.subr.bf16.mxu0 %v3911_v25  ;;  %v3687_v25 = vpack.c.bf16 %v2741_v24, %v2740_v23 }
 0x5b3   : > { %3379 = vmatpush3.bf16.msra.mxu0 %v3912_v26  ;;  %v2742_v26 = vld [vmem:[#allocation13 + $0x70] sm:$0xff] }
 0x5b4   : > { %3380 = vmatprep.subr.bf16.mxu0 %v3915_v7  ;;  %v3690_v27 = vpack.c.bf16 %v2743_v4, %v2742_v26 }
 0x5b7   : > { %3381 = vmatpush3.bf16.msra.mxu0 %v3916_v28 }
 0x5b8   : > { %3382 = vmatprep.subr.bf16.mxu0 %v3919_v30 }
 0x5bb   : > { %3383 = vmatpush3.bf16.msra.mxu0 %v3920_v32 }
 0x5bc   : > { %3668 = vmatprep.subr.bf16.mxu0 %v4141_v17 }
 0x671   : > { %v2229_v33 = vpop.f32.mrb[10].mxu0 }
 0x672   : > { %v2233_v34 = vmul.f32 0.0625, %v2229_v33  ;;  %v3540_v35 = vpop.f32.mrb[11].mxu0 }
 0x674   : > { %v2234_v36 = vmul.f32 %v2233_v34, %v2233_v34  ;;  %v2242_v40 = vrot.slane %v2233_v34, %v4640_v5 }
 0x676   : > { %v2236_v37 = vrot.slane %v2234_v36, 7  ;;  %v2243_v42 = vsub.f32 %v4683_v44, %v2242_v40  ;;  %v3922_v44 = vld [vmem:[%s4859_s10 + $0x108] sm:$0xff]  }
 0x678   : > { %v2238_v38 = vsub.f32 %v2233_v34, %v2236_v37 }
 0x67a   : > { %v2244_v39 = vadd.f32 1e-05, %v2238_v38 }
 0x67c   : > { %3933 = vrsqrt.f32 %v2244_v39 }
 0x686   : > { %v3934_v41 = vpop.eup %3933 }
 0x687   : > { %v2249_v43 = vrot.slane %v3934_v41, %v4643_v8 }
 0x689   : > { %v2250_v45 = vmul.f32 %v2249_v43, %v2243_v42 }
 0x68b   : > { %v2251_v46 = vmax.f32 %v2250_v45, 0.0 }
 0x68d   : > { %2254 = vst [vmem:[#allocation4 + $0x8] sm:$0xf] %v2251_v46 }
 0x694   : > { %v2257_v47 = vld [vmem:[#allocation4 + $0x7] sm:$0xf] }
 0x695   : > { %v2261_v48 = vld [vmem:[#allocation4 + $0x9] sm:$0xf]  ;;  %v2258_v50 = vpack.c.bf16 %v2257_v47, %v2257_v47 }
 0x696   : > { %v2255_v49 = vld [vmem:[#allocation4 + $0x6] sm:$0xf]  ;;  %v2262_v51 = vpack.c.bf16 %v2261_v48, %v2261_v48  ;;  %v2263_v63 = vld [vmem:[#allocation4 + $0xa] sm:$0xf] }
 0x697   : > { %v2256_v52 = vpack.c.bf16 %v2255_v49, %v2255_v49  ;;  %v2259_v53 = vld [vmem:[#allocation4 + $0x8] sm:$0xf]  ;;  %2624 = vmatprep.mubr.bf16.mxu1 %v2258_v50  ;;  %v2264_v1 = vpack.c.bf16 %v2263_v63, %v2263_v63 }
 0x698   : > { %v2260_v55 = vpack.c.bf16 %v2259_v53, %v2259_v53  ;;  %2664 = vmatprep.mubr.bf16.mxu0 %v2262_v51 }
 0x699   : > { %2625 = vmatmul.mubr.bf16.vlgmr.msra.gmra.mrb[20].mxu1 %v2256_v52 }
 0x69a   : > { %2665 = vmatmul.mubr.bf16.vlgmr.msra.gmra.mrb[20].mxu0 %v2260_v55  ;;  %3542 = vmatpush3.bf16.msra.mxu1 %v3921_v54 }
 0x69b   : > { %3557 = vmatprep.mubr.msk.bf16.mxu1 %vm4140_vm0, %v4139_v0  ;;  %3543 = vmatprep.subr.bf16.mxu1 %v4139_v0 }
 0x69c   : > { %3593 = vmatprep.mubr.msk.f32.mxu0 %vm4140_vm0, %v4139_v0  ;;  %3670 = vmatpush3.bf16.msra.mxu0 %v3669_v9 }
 0x69d   : > { %3671 = vmatprep.subr.bf16.mxu0 %v4141_v17 }
 0x69e   : > { %3544 = vmatpush3.bf16.msra.mxu1 %v3922_v44 }
 0x69f   : > { %3545 = vmatprep.subr.bf16.mxu1 %v4139_v0 }
 0x6a0   : > { %3673 = vmatpush3.bf16.msra.mxu0 %v3672_v11 }
 0x6a1   : > { %3674 = vmatprep.subr.bf16.mxu0 %v4141_v17 }
 0x6a2   : > { %3546 = vmatpush3.bf16.msra.mxu1 %v3923_v56 }
 0x6a3   : > { %3547 = vmatprep.subr.bf16.mxu1 %v4139_v0 }
 0x6a4   : > { %3676 = vmatpush3.bf16.msra.mxu0 %v3675_v14 }
 0x6a5   : > { %3677 = vmatprep.subr.bf16.mxu0 %v4141_v17 }
 0x6a6   : > { %3548 = vmatpush3.bf16.msra.mxu1 %v3924_v57 }
 0x6a7   : > { %3549 = vmatprep.subr.bf16.mxu1 %v4139_v0 }
 0x6aa   : > { %3550 = vmatpush3.bf16.msra.mxu1 %v3925_v58 }
 0x6ab   : > { %3551 = vmatprep.subr.bf16.mxu1 %v4139_v0 }
 0x6ae   : > { %3552 = vmatpush3.bf16.msra.mxu1 %v3926_v59 }
 0x6af   : > { %3553 = vmatprep.subr.bf16.mxu1 %v4139_v0 }
 0x6b2   : > { %3554 = vmatpush3.bf16.msra.mxu1 %v3927_v61 }
 0x6b3   : > { %3555 = vmatprep.subr.bf16.mxu1 %v4139_v0  ;;  %v2734_v0 = vld [vmem:[#allocation13 + $0x30] sm:$0xff] }
 0x6b4   : > { %v3678_v15 = vpack.c.bf16 %v2735_v60, %v2734_v0 }
 0x6b6   : > { %3556 = vmatpush3.bf16.msra.mxu1 %v3928_v62  ;;  %3679 = vmatpush3.bf16.msra.mxu0 %v3678_v15 }
 0x6b7   : > { %3680 = vmatprep.subr.bf16.mxu0 %v4141_v17 }
 0x6b9   : > { %3558 = vmatmul.mubr.bf16.vlgmr.msra.gmra.mrb[24].mxu1 %v2264_v1 }
 0x6ba   : > { %3682 = vmatpush3.bf16.msra.mxu0 %v3681_v19 }
 0x6bb   : > { %3683 = vmatprep.subr.bf16.mxu0 %v4141_v17 }
 0x6be   : > { %3685 = vmatpush3.bf16.msra.mxu0 %v3684_v22 }
 0x6bf   : > { %3686 = vmatprep.subr.bf16.mxu0 %v4141_v17 }
 0x6c2   : > { %3688 = vmatpush3.bf16.msra.mxu0 %v3687_v25 }
 0x6c3   : > { %3689 = vmatprep.subr.bf16.mxu0 %v4141_v17 }
 0x6c6   : > { %3691 = vmatpush3.bf16.msra.mxu0 %v3690_v27 }
 0x76c   : > { %v3362_v7 = vpop.f32.mrb[20].mxu1 }
 0x76d   : > { %v3384_v28 = vpop.f32.mrb[20].mxu0  ;;  %v3363_v30 = vpop.f32.mrb[21].mxu1 }
 0x76e   : > { %v3385_v31 = vpop.f32.mrb[21].mxu0  ;;  %v3364_v32 = vadd.f32 %v3363_v30, %v3362_v7  ;;  %v3365_v34 = vpop.f32.mrb[22].mxu1 }
 0x76f   : > { %v3386_v33 = vadd.f32 %v3385_v31, %v3384_v28  ;;  %v3387_v35 = vpop.f32.mrb[22].mxu0  ;;  %v3366_v36 = vpop.f32.mrb[23].mxu1 }
 0x770   : > { %v3388_v37 = vpop.f32.mrb[23].mxu0  ;;  %v2627_v38 = vadd.f32 %v3364_v32, %v3089_v29 }
 0x772   : > { %v2667_v39 = vadd.f32 %v3386_v33, %v2627_v38 }
 0x78c   : > { %v2706_v40 = vpop.f32.mrb[24].mxu1 }
 0x78d   : > { %v2707_v41 = vadd.f32 %v2706_v40, %v2667_v39  ;;  %v3559_v17 = vpop.f32.mrb[25].mxu1 }
 0x78e   : > { %v2709_v42 = vpop.f32.mrb[26].mxu1 }
 0x78f   : > { %v2712_v43 = vsel %vm2130_vm2, %v2707_v41, 0.0  ;;  %v2719_v45 = vmul.f32 %v2707_v41, %v2707_v41  ;;  %v3560_v46 = vpop.f32.mrb[27].mxu1 }
 0x790   : > { %v2713_v47 = vrot.slane %v2712_v43, 4 }
 0x791   : > { %v2720_v48 = vsel %vm2130_vm2, %v2719_v45, 0.0 }
 0x792   : > { %v2714_v49 = vadd.f32 %v2713_v47, %v2712_v43  ;;  %v2721_v50 = vrot.slane %v2720_v48, 4 }
 0x794   : > { %v2715_v51 = vrot.slane %v2714_v49, 2  ;;  %v2722_v52 = vadd.f32 %v2721_v50, %v2720_v48 }
 0x796   : > { %v2716_v53 = vadd.f32 %v2715_v51, %v2714_v49  ;;  %v2723_v54 = vrot.slane %v2722_v52, 2 }
 0x798   : > { %v2717_v55 = vrot.slane %v2716_v53, 1  ;;  %v2724_v44 = vadd.f32 %v2723_v54, %v2722_v52 }
 0x79a   : > { %v2725_v56 = vrot.slane %v2724_v44, 1  ;;  %v2718_v57 = vadd.f32 %v2717_v55, %v2716_v53 }
 0x79c   : > { %v2726_v58 = vadd.f32 %v2725_v56, %v2724_v44 }
 0x79e   : > { %v2727_v59 = vsel %vm1184_vm1, %v2718_v57, %v2726_v58 }
 0x79f   : > { %3594 = vmatmul.mubr.f32.vlgmr.msra.gmra.mrb[24].mxu0 %v2727_v59 }
 0x872   : > { %v2810_v61 = vpop.f32.mrb[24].mxu0 }
 0x873   : > { %v2814_v62 = vmul.f32 0.0625, %v2810_v61  ;;  %v3595_v63 = vpop.f32.mrb[25].mxu0 }
 0x875   : > { %v2815_v1 = vmul.f32 %v2814_v62, %v2814_v62  ;;  %v2823_v9 = vrot.slane %v2814_v62, %v4640_v5 }
 0x877   : > { %v2817_v2 = vrot.slane %v2815_v1, 7  ;;  %v2824_v11 = vsub.f32 %v2707_v41, %v2823_v9 }
 0x879   : > { %v2819_v3 = vsub.f32 %v2814_v62, %v2817_v2 }
 0x87b   : > { %v2825_v6 = vadd.f32 1e-05, %v2819_v3 }
 0x87d   : > { %3935 = vrsqrt.f32 %v2825_v6 }
 0x887   : > { %v3936_v10 = vpop.eup %3935 }
 0x888   : > { %v2830_v12 = vrot.slane %v3936_v10, %v4643_v8 }
 0x88a   : > { %v2831_v13 = vmul.f32 %v2830_v12, %v2824_v11 }
 0x88c   : > { %v2832_v14 = vmax.f32 %v2831_v13, 0.0 }
 0x88e   : > { %2833 = vst [vmem:[%s526_s22] sm:$0xf] %v2832_v14 }
 0x88f PF: > { %s4881_s24 = sld [smem:[#allocation19_spill]] }
 0x895   : > { %s27_s25 = sadd.s32 1, %s4881_s24  }
 0x896   : > { %p24_p9 = scmp.ge.s32.totalorder %s27_s25, 4  }
 0x898   :  { %26 = sbr.rel (!%p24_p9) target bundleno = 6 (0x6), region = 135 }
 0x89f   :  { %2853 = vsyncpa [#allocation6], 1 }
 0x8a0   :  { %2855 = vsyncpa [#allocation6 + $0x1], 1 }
 0x8a1   :  { %2856 = vsyncpa [#allocation8], 1 }
 0x8a2   :  { %2857 = vsyncpa [#allocation11], 1 }
 0x8a3   :  { %2858 = vsyncpa [#allocation14], 1 }

</bundles_post_ra>
